<compile_context>
chip_gen: v7x
topology: tpu7x:2x2x1
jax: 0.10.0
libtpu: 0.0.40
codegen_flags: <defaults>
</compile_context>

<pallas_src>
import numpy as np
import jax
import jax.numpy as jnp
from jax import lax
from jax.experimental import pallas as pl
from jax.experimental.pallas import tpu as pltpu


def _round_up(x, m):
    return ((x + m - 1) // m) * m


def _cdiv(a, b):
    return -(-a // b)


def _vmem_capacity_bytes():
    try:
        return pltpu.get_tpu_info().vmem_capacity_bytes
    except Exception:
        return 64 * 1024 * 1024  # conservative (v7x-sized) fallback


def _pick_tq(batch, q, small_vmem):
    """Query-tile size.  Larger tiles amortize re-streaming of the target tensor
    (it is re-read from HBM once per q-tile); on a 2-TensorCore chip (v7x class)
    make sure there are at least two 'parallel' grid slots when batch == 1."""
    tq = 256 if q > 128 else 128
    if small_vmem:                       # v7x: two TensorCores per chip
        while tq > 64 and batch * _cdiv(max(q, 1), tq) < 2:
            tq //= 2
    return tq


def _make_assigner_kernel(m_real, return_cost):
    """m_real: number of real (unpadded) target masks, closed over at trace time."""

    def kernel(pred_ref, tgt_ref, tsum_ref, *refs):
        if return_cost:
            cost_ref, mval_ref, midx_ref, acc_num = refs
        else:
            mval_ref, midx_ref, acc_num = refs
            cost_ref = None

        k = pl.program_id(2)

        @pl.when(k == 0)
        def _init():
            acc_num[...] = jnp.zeros_like(acc_num)

        # Masks arrive pre-binarized as int8 (1 byte/elem of HBM traffic);
        # upcast in-register to bf16 for an exact 0/1 MXU matmul, f32 accum.
        inputs = pred_ref[0].astype(jnp.bfloat16)        # (TQ, TC)
        tgt = tgt_ref[0].astype(jnp.bfloat16)            # (M_pad, TC)

        # Contract the C dims directly ('qc,mc->qm'); no wrapper transpose.
        acc_num[...] += lax.dot_general(
            inputs, tgt,
            dimension_numbers=(((1,), (1,)), ((), ())),
            preferred_element_type=jnp.float32)

        @pl.when(k == pl.num_programs(2) - 1)
        def _finalize():
            acc = acc_num[...]                           # (TQ, M_pad)
            col = lax.broadcasted_iota(jnp.int32, acc.shape, 1)
            # Row m_real of the padded targets was set to all ones in the
            # wrapper, so column m_real of the accumulator holds the per-query
            # prediction row-sum -- obtained for free from the MXU instead of a
            # per-step f32 upcast + lane reduction on the VPU/XLU.
            isum = jnp.sum(jnp.where(col == m_real, acc, 0.0),
                           axis=-1, keepdims=True)       # (TQ, 1)
            tsum = tsum_ref[0]                           # (1, M_pad), wrapper-computed
            loss = 1.0 - (2.0 * acc + 1.0) / (isum + tsum + 1.0)
            # Mask padded target columns (incl. the ones-column) so they can
            # never win the min / argmin.
            loss = jnp.where(col < m_real, loss, jnp.inf)
            mval = jnp.min(loss, axis=-1, keepdims=True)             # (TQ, 1)
            # First minimal index -> matches torch.min tie-break.
            midx = jnp.min(
                jnp.where(loss == mval, col, jnp.int32(loss.shape[1])),
                axis=-1, keepdims=True)                               # (TQ, 1)
            mval_ref[0] = mval
            midx_ref[0] = midx
            if return_cost:
                cost_ref[0] = loss

    return kernel


def label_assigner_costs(pred_masks, tgt_masks, *, return_cost=False, max_tc=None):
    """pred_masks: [B, Q, H, W] float logits; tgt_masks: [B, M, Hg, Wg] binary {0,1}.

    Returns (cost [B,Q,M] or None, min_val [B,Q] f32, min_idx [B,Q] int32)."""
    B, Q, H, W = pred_masks.shape
    _, M, Hg, Wg = tgt_masks.shape
    assert H * W == Hg * Wg, "pred/target masks must flatten to the same length"
    C = H * W

    vmem_cap = _vmem_capacity_bytes()
    small_vmem = vmem_cap < 100 * 1024 * 1024            # v7x-class (64 MiB VMEM)
    vmem_limit = int(min(vmem_cap - 16 * 1024 * 1024, 96 * 1024 * 1024))

    TQ = _pick_tq(B, Q, small_vmem)
    Q_pad = max(_round_up(Q, TQ), TQ)
    # Reserve one spare target row for the all-ones "row-sum" trick.
    M_pad = max(_round_up(M + 1, 128), 128)

    # --- C tiling: size TC from the actual double-buffered block footprint ----
    # per C column: 2x int8 double-buffered input streams + their in-kernel bf16
    # upcasts; fixed: f32 accumulator (+ double-buffered cost block if requested).
    bytes_per_c = 4 * (TQ + M_pad)
    fixed = 4 * TQ * M_pad * (3 if return_cost else 1)
    budget = int(0.70 * vmem_limit) - fixed
    tc_cap = max(1024, min(16384, budget // bytes_per_c))
    if max_tc is not None:
        tc_cap = max_tc
    # Adaptive TC: padding waste bounded by num_k*128 columns (not up to TC-1).
    num_k = max(_cdiv(C, tc_cap), 1)
    TC = max(_round_up(_cdiv(C, num_k), 128), 128)
    C_pad = num_k * TC

    # Pre-binarize in the wrapper (sigmoid(x) > 0.5  <=>  x > 0, decided in f32)
    # and ship 1-byte masks: halves the HBM traffic of the dominant streams.
    pred = (pred_masks.reshape(B, Q, C) > 0).astype(jnp.int8)
    pred = jnp.pad(pred, ((0, 0), (0, Q_pad - Q), (0, C_pad - C)))
    # Targets assumed binary {0,1}; kept (B, M_pad, C_pad) — no HBM transpose.
    tgt = tgt_masks.reshape(B, M, C).astype(jnp.int8)
    tgt = jnp.pad(tgt, ((0, 0), (0, M_pad - M), (0, C_pad - C)))
    tgt = tgt.at[:, M, :].set(jnp.int8(1))               # ones row -> pred row-sums
    # Target column sums, computed once here (fuses with the cast/pad pass)
    # instead of once per grid step inside the kernel.
    tsum = jnp.sum(tgt_masks.reshape(B, M, C).astype(jnp.float32), axis=-1)
    tsum = jnp.pad(tsum, ((0, 0), (0, M_pad - M))).reshape(B, 1, M_pad)

    grid = (B, Q_pad // TQ, num_k)

    in_specs = [
        pl.BlockSpec((1, TQ, TC), lambda b, q, k: (b, q, k)),
        pl.BlockSpec((1, M_pad, TC), lambda b, q, k: (b, 0, k)),
        pl.BlockSpec((1, 1, M_pad), lambda b, q, k: (b, 0, 0)),
    ]
    out_shape = []
    out_specs = []
    if return_cost:
        out_shape.append(jax.ShapeDtypeStruct((B, Q_pad, M_pad), jnp.float32))
        out_specs.append(pl.BlockSpec((1, TQ, M_pad), lambda b, q, k: (b, q, 0)))
    out_shape += [
        jax.ShapeDtypeStruct((B, Q_pad, 1), jnp.float32),
        jax.ShapeDtypeStruct((B, Q_pad, 1), jnp.int32),
    ]
    out_specs += [
        pl.BlockSpec((1, TQ, 1), lambda b, q, k: (b, q, 0)),
        pl.BlockSpec((1, TQ, 1), lambda b, q, k: (b, q, 0)),
    ]

    scratch_shapes = [pltpu.VMEM((TQ, M_pad), jnp.float32)]   # numerator accumulator

    outs = pl.pallas_call(
        _make_assigner_kernel(M, return_cost),
        out_shape=tuple(out_shape),
        grid_spec=pltpu.PrefetchScalarGridSpec(
            num_scalar_prefetch=0,
            grid=grid,
            in_specs=in_specs,
            out_specs=out_specs,
            scratch_shapes=scratch_shapes),
        compiler_params=pltpu.CompilerParams(
            dimension_semantics=("parallel", "parallel", "arbitrary"),
            vmem_limit_bytes=vmem_limit),
    )(pred, tgt, tsum)

    if return_cost:
        cost_pad, min_val, min_idx = outs
        cost = cost_pad[:, :Q, :M]
    else:
        min_val, min_idx = outs
        cost = None
    return cost, min_val[:, :Q, 0], min_idx[:, :Q, 0]


def label_assigner_forward(outputs, targets):
    """Mirrors LabelAssigner.memory_efficient_forward.

    outputs: {"pred_logits": [B,Q,K], "pred_masks": [B,Q,H,W]}
    targets: list of {"labels": [M], "masks": [M,Hg,Wg]} (same M per batch element)
    Returns list of (index_i, index_j) int64 numpy arrays.
    """
    pred_masks = outputs["pred_masks"]
    # TODO(synk): variable M per batch element needs ragged batching; here all
    # batch elements are assumed to carry the same number of target masks.
    tgt_masks = jnp.stack([t["masks"] for t in targets], axis=0)
    _, min_val, min_idx = label_assigner_costs(pred_masks, tgt_masks,
                                               return_cost=False)
    min_val = np.asarray(jax.block_until_ready(min_val))
    min_idx = np.asarray(min_idx)
    indices = []
    Q = pred_masks.shape[1]
    for b in range(pred_masks.shape[0]):
        valid = min_val[b] < 0.4        # M == 0 -> min_val == +inf -> no matches
        idx_i = np.arange(Q, dtype=np.int64)[valid]
        idx_j = min_idx[b][valid].astype(np.int64)
        indices.append((idx_i, idx_j))
    return indices


def _reference_costs(pred_masks, tgt_masks):
    B, Q, H, W = pred_masks.shape
    M = tgt_masks.shape[1]
    pred = np.asarray(pred_masks, dtype=np.float32).reshape(B, Q, -1)
    tgt = np.asarray(tgt_masks, dtype=np.float32).reshape(B, M, -1)
    inp = (1.0 / (1.0 + np.exp(-pred)) > 0.5).astype(np.float32)
    num = 2.0 * np.einsum("bnc,bmc->bnm", inp, tgt)
    den = inp.sum(-1)[:, :, None] + tgt.sum(-1)[:, None, :]
    return 1.0 - (num + 1.0) / (den + 1.0)


if __name__ == "__main__":
    key = jax.random.PRNGKey(0)

    # --- Case 1: small shapes, single C tile, full-cost verification ----------
    B, Q, M, H, W = 2, 8, 8, 16, 16
    k1, k2, k3 = jax.random.split(key, 3)
    pred_logits = jax.random.normal(k1, (B, Q, 4), dtype=jnp.float32)
    pred_masks = jax.random.normal(k2, (B, Q, H, W), dtype=jnp.float32) * 2.0
    tgt_masks = (jax.random.uniform(k3, (B, M, H, W)) > 0.5).astype(jnp.float32)

    outputs = {"pred_logits": pred_logits, "pred_masks": pred_masks}
    targets = [{"labels": jnp.zeros((M,), jnp.int32), "masks": tgt_masks[b]}
               for b in range(B)]

    cost, min_val, min_idx = label_assigner_costs(pred_masks, tgt_masks,
                                                  return_cost=True)
    jax.block_until_ready(cost)

    ref = _reference_costs(pred_masks, tgt_masks)
    np.testing.assert_allclose(np.asarray(cost), ref, rtol=1e-5, atol=1e-5)
    np.testing.assert_allclose(np.asarray(min_val), ref.min(axis=-1),
                               rtol=1e-5, atol=1e-5)
    np.testing.assert_array_equal(np.asarray(min_idx), ref.argmin(axis=-1))

    indices = label_assigner_forward(outputs, targets)
    assert len(indices) == B
    for b in range(B):
        ref_val = ref[b].min(axis=-1)
        ref_valid = np.arange(Q, dtype=np.int64)[ref_val < 0.4]
        np.testing.assert_array_equal(indices[b][0], ref_valid)
        np.testing.assert_array_equal(indices[b][1],
                                      ref[b].argmin(axis=-1)[ref_val < 0.4])

    # --- Case 2: force multiple C tiles (grid reduction axis) -----------------
    B2, Q2, M2, H2, W2 = 1, 4, 5, 40, 40
    k4, k5 = jax.random.split(k3, 2)
    pred_masks2 = jax.random.normal(k4, (B2, Q2, H2, W2), dtype=jnp.float32)
    tgt_masks2 = (jax.random.uniform(k5, (B2, M2, H2, W2)) > 0.5).astype(jnp.float32)
    cost2, min_val2, min_idx2 = label_assigner_costs(
        pred_masks2, tgt_masks2, return_cost=True, max_tc=512)
    jax.block_until_ready(cost2)
    ref2 = _reference_costs(pred_masks2, tgt_masks2)
    np.testing.assert_allclose(np.asarray(cost2), ref2, rtol=1e-5, atol=1e-5)
    np.testing.assert_allclose(np.asarray(min_val2), ref2.min(axis=-1),
                               rtol=1e-5, atol=1e-5)
    np.testing.assert_array_equal(np.asarray(min_idx2), ref2.argmin(axis=-1))

    print("KERNEL_OK")
</pallas_src>

<mosaic_0001>
module attributes {stable_mosaic.version = 11 : i64} {
  func.func @kernel(%arg0: i32, %arg1: i32, %arg2: i32, %arg3: memref<1x128x256xi8, #tpu.memory_space<vmem>>, %arg4: memref<1x128x256xi8, #tpu.memory_space<vmem>>, %arg5: memref<1x1x128xf32, #tpu.memory_space<vmem>>, %arg6: memref<1x128x128xf32, #tpu.memory_space<vmem>>, %arg7: memref<1x128x1xf32, #tpu.memory_space<vmem>>, %arg8: memref<1x128x1xi32, #tpu.memory_space<vmem>>, %arg9: memref<128x128xf32, #tpu.memory_space<vmem>>) attributes {dimension_semantics = [#tpu.dimension_semantics<parallel>, #tpu.dimension_semantics<parallel>, #tpu.dimension_semantics<arbitrary>], iteration_bounds = array<i64: 2, 1, 1>, scalar_prefetch = 0 : i64, scratch_operands = 1 : i64, tpu.core_type = #tpu.core_type<tc>, window_params = [{transform_indices = @transform_0, window_bounds = array<i64: 1, 128, 256>}, {transform_indices = @transform_1, window_bounds = array<i64: 1, 128, 256>}, {transform_indices = @transform_2, window_bounds = array<i64: 1, 1, 128>}, {transform_indices = @transform_3, window_bounds = array<i64: 1, 128, 128>}, {transform_indices = @transform_4, window_bounds = array<i64: 1, 128, 1>}, {transform_indices = @transform_5, window_bounds = array<i64: 1, 128, 1>}]} {
    %c0_i32 = arith.constant 0 : i32
    %0 = arith.cmpi eq, %arg2, %c0_i32 : i32
    %1 = arith.extui %0 : i1 to i32
    %c0_i32_0 = arith.constant 0 : i32
    %2 = arith.cmpi ne, %1, %c0_i32_0 : i32
    scf.if %2 {
      %cst_12 = arith.constant 0.000000e+00 : f32
      %16 = vector.broadcast %cst_12 : f32 to vector<128x128xf32>
      %c0_13 = arith.constant 0 : index
      %c0_14 = arith.constant 0 : index
      %17 = vector.load %arg9[%c0_13, %c0_14] : memref<128x128xf32, #tpu.memory_space<vmem>>, vector<128x128xf32>
      tpu.vector_store %arg9[%c0_13, %c0_14], %16 {strides = array<i32>} : memref<128x128xf32, #tpu.memory_space<vmem>>, vector<128x128xf32>,
    } else {
    }
    %c0 = arith.constant 0 : index
    %c0_1 = arith.constant 0 : index
    %c0_2 = arith.constant 0 : index
    %3 = vector.load %arg3[%c0, %c0_1, %c0_2] : memref<1x128x256xi8, #tpu.memory_space<vmem>>, vector<1x128x256xi8>
    %4 = vector.shape_cast %3 : vector<1x128x256xi8> to vector<128x256xi8>
    %5 = arith.sitofp %4 : vector<128x256xi8> to vector<128x256xbf16>
    %c0_3 = arith.constant 0 : index
    %c0_4 = arith.constant 0 : index
    %c0_5 = arith.constant 0 : index
    %6 = vector.load %arg4[%c0_3, %c0_4, %c0_5] : memref<1x128x256xi8, #tpu.memory_space<vmem>>, vector<1x128x256xi8>
    %7 = vector.shape_cast %6 : vector<1x128x256xi8> to vector<128x256xi8>
    %8 = arith.sitofp %7 : vector<128x256xi8> to vector<128x256xbf16>
    %c0_6 = arith.constant 0 : index
    %c0_7 = arith.constant 0 : index
    %9 = vector.load %arg9[%c0_6, %c0_7] : memref<128x128xf32, #tpu.memory_space<vmem>>, vector<128x128xf32>
    %cst = arith.constant dense<0.000000e+00> : vector<128x128xf32>
    %10 = tpu.matmul %5, %8, %cst {dimension_numbers = #tpu.dot_dimension_numbers<[1], [1], [0], [0], [0, 0, 1, 0], [], []>} : vector<128x256xbf16>, vector<128x256xbf16>, vector<128x128xf32> -> vector<128x128xf32>
    %11 = arith.addf %9, %10 : vector<128x128xf32>
    %c0_8 = arith.constant 0 : index
    %c0_9 = arith.constant 0 : index
    %12 = vector.load %arg9[%c0_8, %c0_9] : memref<128x128xf32, #tpu.memory_space<vmem>>, vector<128x128xf32>
    tpu.vector_store %arg9[%c0_8, %c0_9], %11 {strides = array<i32>} : memref<128x128xf32, #tpu.memory_space<vmem>>, vector<128x128xf32>,
    %c0_i32_10 = arith.constant 0 : i32
    %13 = arith.cmpi eq, %arg2, %c0_i32_10 : i32
    %14 = arith.extui %13 : i1 to i32
    %c0_i32_11 = arith.constant 0 : i32
    %15 = arith.cmpi ne, %14, %c0_i32_11 : i32
    scf.if %15 {
      %c0_12 = arith.constant 0 : index
      %c0_13 = arith.constant 0 : index
      %16 = vector.load %arg9[%c0_12, %c0_13] : memref<128x128xf32, #tpu.memory_space<vmem>>, vector<128x128xf32>
      %17 = tpu.iota {dimensions = array<i32: 1>} : vector<128x128xi32>
      %c8_i32 = arith.constant 8 : i32
      %18 = vector.broadcast %c8_i32 : i32 to vector<128x128xi32>
      %19 = arith.cmpi eq, %17, %18 : vector<128x128xi32>
      %cst_14 = arith.constant 0.000000e+00 : f32
      %20 = vector.broadcast %cst_14 : f32 to vector<128x128xf32>
      %21 = arith.select %19, %16, %20 : vector<128x128xi1>, vector<128x128xf32>
      %cst_15 = arith.constant dense<0.000000e+00> : vector<128xf32>
      %22 = vector.multi_reduction <add>, %21, %cst_15 [1] : vector<128x128xf32> to vector<128xf32>
      %23 = vector.shape_cast %22 : vector<128xf32> to vector<128x1xf32>
      %c0_16 = arith.constant 0 : index
      %c0_17 = arith.constant 0 : index
      %c0_18 = arith.constant 0 : index
      %24 = vector.load %arg5[%c0_16, %c0_17, %c0_18] : memref<1x1x128xf32, #tpu.memory_space<vmem>>, vector<1x1x128xf32>
      %25 = vector.shape_cast %24 : vector<1x1x128xf32> to vector<1x128xf32>
      %cst_19 = arith.constant 2.000000e+00 : f32
      %26 = vector.broadcast %cst_19 : f32 to vector<128x128xf32>
      %27 = arith.mulf %26, %16 : vector<128x128xf32>
      %cst_20 = arith.constant 1.000000e+00 : f32
      %28 = vector.broadcast %cst_20 : f32 to vector<128x128xf32>
      %29 = arith.addf %27, %28 : vector<128x128xf32>
      %30 = vector.broadcast %23 : vector<128x1xf32> to vector<128x128xf32>
      %31 = vector.broadcast %25 : vector<1x128xf32> to vector<128x128xf32>
      %32 = arith.addf %30, %31 : vector<128x128xf32>
      %cst_21 = arith.constant 1.000000e+00 : f32
      %33 = vector.broadcast %cst_21 : f32 to vector<128x128xf32>
      %34 = arith.addf %32, %33 : vector<128x128xf32>
      %35 = arith.divf %29, %34 : vector<128x128xf32>
      %cst_22 = arith.constant 1.000000e+00 : f32
      %36 = vector.broadcast %cst_22 : f32 to vector<128x128xf32>
      %37 = arith.subf %36, %35 : vector<128x128xf32>
      %c8_i32_23 = arith.constant 8 : i32
      %38 = vector.broadcast %c8_i32_23 : i32 to vector<128x128xi32>
      %39 = arith.cmpi slt, %17, %38 : vector<128x128xi32>
      %cst_24 = arith.constant 0x7F800000 : f32
      %40 = vector.broadcast %cst_24 : f32 to vector<128x128xf32>
      %41 = arith.select %39, %37, %40 : vector<128x128xi1>, vector<128x128xf32>
      %cst_25 = arith.constant dense<0x7F800000> : vector<128xf32>
      %42 = vector.multi_reduction <minimumf>, %41, %cst_25 [1] : vector<128x128xf32> to vector<128xf32>
      %43 = vector.shape_cast %42 : vector<128xf32> to vector<128x1xf32>
      %44 = vector.broadcast %43 : vector<128x1xf32> to vector<128x128xf32>
      %45 = arith.cmpf oeq, %41, %44 : vector<128x128xf32>
      %c128_i32 = arith.constant 128 : i32
      %46 = vector.broadcast %c128_i32 : i32 to vector<128x128xi32>
      %47 = arith.select %45, %17, %46 : vector<128x128xi1>, vector<128x128xi32>
      %cst_26 = arith.constant dense<2147483647> : vector<128xi32>
      %48 = vector.multi_reduction <minsi>, %47, %cst_26 [1] : vector<128x128xi32> to vector<128xi32>
      %49 = vector.shape_cast %48 : vector<128xi32> to vector<128x1xi32>
      %c0_27 = arith.constant 0 : index
      %c0_28 = arith.constant 0 : index
      %c0_29 = arith.constant 0 : index
      %50 = vector.load %arg7[%c0_27, %c0_28, %c0_29] : memref<1x128x1xf32, #tpu.memory_space<vmem>>, vector<1x128x1xf32>
      %51 = vector.shape_cast %50 : vector<1x128x1xf32> to vector<128x1xf32>
      %52 = vector.shape_cast %43 : vector<128x1xf32> to vector<1x128x1xf32>
      tpu.vector_store %arg7[%c0_27, %c0_28, %c0_29], %52 {strides = array<i32>} : memref<1x128x1xf32, #tpu.memory_space<vmem>>, vector<1x128x1xf32>,
      %c0_30 = arith.constant 0 : index
      %c0_31 = arith.constant 0 : index
      %c0_32 = arith.constant 0 : index
      %53 = vector.load %arg8[%c0_30, %c0_31, %c0_32] : memref<1x128x1xi32, #tpu.memory_space<vmem>>, vector<1x128x1xi32>
      %54 = vector.shape_cast %53 : vector<1x128x1xi32> to vector<128x1xi32>
      %55 = vector.shape_cast %49 : vector<128x1xi32> to vector<1x128x1xi32>
      tpu.vector_store %arg8[%c0_30, %c0_31, %c0_32], %55 {strides = array<i32>} : memref<1x128x1xi32, #tpu.memory_space<vmem>>, vector<1x128x1xi32>,
      %c0_33 = arith.constant 0 : index
      %c0_34 = arith.constant 0 : index
      %c0_35 = arith.constant 0 : index
      %56 = vector.load %arg6[%c0_33, %c0_34, %c0_35] : memref<1x128x128xf32, #tpu.memory_space<vmem>>, vector<1x128x128xf32>
      %57 = vector.shape_cast %56 : vector<1x128x128xf32> to vector<128x128xf32>
      %58 = vector.shape_cast %41 : vector<128x128xf32> to vector<1x128x128xf32>
      tpu.vector_store %arg6[%c0_33, %c0_34, %c0_35], %58 {strides = array<i32>} : memref<1x128x128xf32, #tpu.memory_space<vmem>>, vector<1x128x128xf32>,
    } else {
    }
    return
  }
  func.func @transform_0(%arg0: i32, %arg1: i32, %arg2: i32) -> (i32, i32, i32) {
    %c0_i32 = arith.constant 0 : i32
    return %arg0, %arg1, %arg2 : i32, i32, i32
  }
  func.func @transform_1(%arg0: i32, %arg1: i32, %arg2: i32) -> (i32, i32, i32) {
    %c0_i32 = arith.constant 0 : i32
    %c0_i32_0 = arith.constant 0 : i32
    return %arg0, %c0_i32, %arg2 : i32, i32, i32
  }
  func.func @transform_2(%arg0: i32, %arg1: i32, %arg2: i32) -> (i32, i32, i32) {
    %c0_i32 = arith.constant 0 : i32
    %c0_i32_0 = arith.constant 0 : i32
    %c0_i32_1 = arith.constant 0 : i32
    return %arg0, %c0_i32, %c0_i32_0 : i32, i32, i32
  }
  func.func @transform_3(%arg0: i32, %arg1: i32, %arg2: i32) -> (i32, i32, i32) {
    %c0_i32 = arith.constant 0 : i32
    %c0_i32_0 = arith.constant 0 : i32
    return %arg0, %arg1, %c0_i32 : i32, i32, i32
  }
  func.func @transform_4(%arg0: i32, %arg1: i32, %arg2: i32) -> (i32, i32, i32) {
    %c0_i32 = arith.constant 0 : i32
    %c0_i32_0 = arith.constant 0 : i32
    return %arg0, %arg1, %c0_i32 : i32, i32, i32
  }
  func.func @transform_5(%arg0: i32, %arg1: i32, %arg2: i32) -> (i32, i32, i32) {
    %c0_i32 = arith.constant 0 : i32
    %c0_i32_0 = arith.constant 0 : i32
    return %arg0, %arg1, %c0_i32 : i32, i32, i32
  }
}

</mosaic_0001>

<bundles_post_ra>
// kernel: tpu_custom_call.1
= control target key start
LH: loop header
LB: loop body
LE: loop exit
PB: predicated region body
PF: predicated region fallthrough
CT: control target
= control target key end

     0   :  { %s2524_s0 = inlined_call_operand.hbm [shape: s8[2,128,256], index: 0, kind: input, shape index: {}]   ;;  %s2525_s1 = inlined_call_operand.hbm [shape: s8[2,128,256], index: 1, kind: input, shape index: {}]   ;;  %s2526_s2 = inlined_call_operand.vmem [shape: f32[2,1,128], index: 2, kind: input, shape index: {}]   ;;  %s2527_s3 = inlined_call_operand.hbm [shape: f32[2,128,128], index: 3, kind: output, shape index: {0}]   ;;  %s2528_s4 = inlined_call_operand.vmem [shape: f32[2,128,1], index: 4, kind: output, shape index: {1}]   ;;  %s2529_s5 = inlined_call_operand.vmem [shape: s32[2,128,1], index: 5, kind: output, shape index: {2}]  }
   0x1   :  { %2533 = sst [smem:[#allocation12_spill]] %s2524_s0 }
   0x2   :  { %11 = vsyncpa [#allocation4], 0 }
   0x3   :  { %13 = vsyncpa [#allocation4 + $0x1], 0 }
   0x4   :  { %14 = vsyncpa [#allocation7], 0 }
   0x5   :  { %16 = vsyncpa [#allocation7 + $0x1], 0 }
   0x6   :  { %17 = vsyncpa [#allocation5], 0 }
   0x7   :  { %19 = vsyncpa [#allocation5 + $0x1], 0  ;;  %s1715_s18 = smov 0   ;;  %s1717_s19 = smov 0  }
   0x8   :  { %s1719_s20 = smov 0   ;;  %s1721_s21 = smov 0  }
   0x9   :  { %s1723_s22 = smov 0   ;;  %s1725_s23 = smov 0  }
   0xa LB: > { %s1382_s24 = sadd.s32 4294967295, %s1676_s23   ;;  %s1383_s25 = sadd.s32 4294967294, %s1676_s23   ;;  %s1676_s23 = sphi %s1725_s23, %s25_s23   ;;  %s1672_s22 = sphi %s1723_s22, %s2551_s22   ;;  %s1668_s21 = sphi %s1721_s21, %s2550_s21   ;;  %s1664_s20 = sphi %s1719_s20, %s2549_s20   ;;  %s1660_s19 = sphi %s1717_s19, %s2548_s19   ;;  %s1656_s18 = sphi %s1715_s18, %s2547_s18  }
   0xb   : > { %s44_s26 = sadd.s32 1, %s1672_s22  ;;  %s55_s27 = sadd.s32 1, %s1664_s20 }
   0xc   : > { %p46_p0 = scmp.ge.s32.totalorder %s44_s26, 2  ;;  %p62_p1 = scmp.ne.s32.totalorder %s1664_s20, %s1660_s19 }
   0xd   : > { %p63_p2 = scmp.eq.s32.totalorder %s1676_s23, 0  ;;  %p68_p3 = scmp.ne.s32.totalorder %s1660_s19, %s1656_s18 }
   0xe   : > { %s2553_s26 = smov (%p46_p0, %s44_s26), 0  ;;  %p69_p5 = scmp.eq.s32.totalorder %s1382_s24, 0 }
   0xf   : > { %p1756_p4 = por %p63_p2, %p62_p1  ;;  %s48_s29 = ssub.s32 %s1672_s22, %s2553_s26 }
  0x10   : > { %p148_p6 = scmp.eq.s32.totalorder %s1382_s24, 1  ;;  %p53_p7 = scmp.eq.s32.totalorder %s48_s29, 0 }
  0x11   : > { %p1762_p8 = por %p69_p5, %p68_p3  ;;  %p154_p10 = scmp.eq.s32.totalorder %s1383_s25, 1 }
  0x12   : > { %p1766_p9 = por %p148_p6, %p62_p1  ;;  %p1444_p13 = scmp.lt.s32.totalorder %s1676_s23, 2 }
  0x13   : > { %s2535_s30 = scalar_select %p1762_p8, 1, 0 }
  0x14   : > { %s2536_s6 = scalar_select %p1766_p9, 1, 0 }
  0x15   : > { %s1771_s7 = scalar_select %p53_p7, %s1664_s20, %s55_s27  }
  0x16   : > { %p1773_p11 = por %p154_p10, %p68_p3  ;;  %s1780_s9 = sand.u32 1, %s1664_s20  }
  0x17   : > { %s1386_s10 = sshll.u32 %s1780_s9, 6  ;;  %s1406_s11 = sshll.u32 %s1672_s22, 10 }
  0x18   : > { %s2537_s8 = scalar_select %p1773_p11, 1, 0 }
  0x19   : > { %s2538_s0 = sld [smem:[#allocation12_spill]]  ;;  %s234_s15 = scalar_lea.vmem [#allocation3], %s1386_s10 }
  0x1a   : > { %s246_s16 = sshll.u32 %s234_s15, 4  ;;  %p1797_p0 = pnand %p1444_p13, %p1756_p4  ;;  %s1793_s16 = int_to_ptr.vmem [resolvable:$true] %s246_s16 }
  0x1b   : > { %s231_s24 = scalar_lea.sflag [#allocation4], %s1780_s9 }
  0x1c   : > { %p1532_p3 = pneg %p1797_p0 }
  0x1f   : > { %s1789_s14 = scalar_lea.hbm %s2538_s0, %s1406_s11  ;;  %s1535_s28 = scalar_lea.hbm %s2538_s0, 2048 }
  0x20   : > { %s1530_s25 = scalar_lea.hbm %s1789_s14, 1024  ;;  %p1536_p4 = scmp.lt.u32.totalorder %s1789_s14, %s2538_s0 }
  0x21   : > { %p1531_p2 = scmp.ne.s32.totalorder %s1789_s14, %s1530_s25  ;;  %p1537_p7 = scmp.lt.u32.totalorder %s1535_s28, %s1530_s25 }
  0x22   : > { %p1539_p13 = scmp.lt.u32.totalorder %s1530_s25, %s1789_s14 }
  0x23   : > { %p1533_p5 = pnand %p1532_p3, %p1531_p2  ;;  %p1538_p10 = por %p1537_p7, %p1536_p4 }
  0x25   : > { %p1534_p6 = pneg %p1533_p5  ;;  %p1540_p12 = por %p1539_p13, %p1538_p10 }
  0x27   : > { %p1541_p1 = pnand %p1540_p12, %p1534_p6 }
  0x29   : > { %1544 = shalt.err (!%p1541_p1)
}
  0x2a   : > { %s1545_s15 = scalar_lea.vmem %s1793_s16, 1024  ;;  %s1678_s27 = smov [#allocation3]  }
  0x2b   : > { %p1546_p2 = scmp.ne.s32.totalorder %s1793_s16, %s1545_s15  ;;  %s1550_s29 = sshll.u32 %s1678_s27, 4  ;;  %s1551_s29 = int_to_ptr.vmem [resolvable:$false] %s1550_s29 }
  0x2c   : > { %s1552_s12 = scalar_lea.vmem %s1551_s29, 2048  ;;  %p1553_p9 = scmp.lt.s32.totalorder %s1793_s16, %s1551_s29 }
  0x2d   : > { %p1548_p5 = pnand %p1546_p2, %p1532_p3  ;;  %p1554_p4 = scmp.lt.s32.totalorder %s1552_s12, %s1545_s15 }
  0x2f   : > { %p1549_p11 = pneg %p1548_p5  ;;  %p1555_p7 = por %p1554_p4, %p1553_p9 }
  0x31   : > { %p1556_p10 = pnand %p1555_p7, %p1549_p11 }
  0x33   : > { %1559 = shalt.err (!%p1556_p10)
}
  0x34   : > { %s2531_s25 = smov 256   ;;  %s1680_s28 = smov 16  }
  0x35   : > { %1436 = dma.hbm_to_vmem [thread:$0]  (!%p1797_p0), %s1789_s14, 1024, %s1793_s16, %s231_s24, %s2531_s25, %s2531_s25, %s1680_s28  }
  0x36   : > { %p283_p9 = scmp.lt.s32.totalorder %s1676_s23, 3  ;;  %s1839_s27 = scalar_lea.hbm %s2525_s1, %s1406_s11 }
  0x37   : > { %p2540_p11 = scmp.ge.s32.totalorder %s1676_s23, 1  ;;  %s260_s12 = scalar_lea.vmem [#allocation6], %s1386_s10 }
  0x38   : > { %s269_s0 = sshll.u32 %s260_s12, 4  ;;  %s257_s14 = scalar_lea.sflag [#allocation7], %s1780_s9  ;;  %s1849_s0 = int_to_ptr.vmem [resolvable:$true] %s269_s0 }
  0x39   : > { %p1843_p12 = pnand %p2540_p11, %p283_p9  ;;  %s1560_s16 = scalar_lea.hbm %s1839_s27, 1024 }
  0x3a   : > { %p1561_p1 = scmp.ne.s32.totalorder %s1839_s27, %s1560_s16  ;;  %s1565_s13 = scalar_lea.hbm %s2525_s1, 2048 }
  0x3b   : > { %p1566_p2 = scmp.lt.u32.totalorder %s1839_s27, %s2525_s1  ;;  %p1567_p5 = scmp.lt.u32.totalorder %s1565_s13, %s1560_s16 }
  0x3c   : > { %p1563_p6 = pnand %p1561_p1, %p1532_p3  ;;  %p1569_p7 = scmp.lt.u32.totalorder %s1560_s16, %s1839_s27 }
  0x3d   : > { %p1568_p4 = por %p1567_p5, %p1566_p2 }
  0x3e   : > { %p1564_p13 = pneg %p1563_p6 }
  0x3f   : > { %p1570_p10 = por %p1569_p7, %p1568_p4 }
  0x41   : > { %p1571_p9 = pnand %p1570_p10, %p1564_p13 }
  0x43   : > { %1574 = shalt.err (!%p1571_p9)
}
  0x44   : > { %s1575_s10 = scalar_lea.vmem %s1849_s0, 1024  ;;  %s1681_s12 = smov [#allocation6]  }
  0x45   : > { %p1576_p11 = scmp.ne.s32.totalorder %s1849_s0, %s1575_s10  ;;  %s1580_s11 = sshll.u32 %s1681_s12, 4  ;;  %s1581_s11 = int_to_ptr.vmem [resolvable:$false] %s1580_s11 }
  0x46   : > { %s1582_s25 = scalar_lea.vmem %s1581_s11, 2048  ;;  %p1583_p8 = scmp.lt.s32.totalorder %s1849_s0, %s1581_s11 }
  0x47   : > { %p1578_p1 = pnand %p1576_p11, %p1532_p3  ;;  %p1584_p2 = scmp.lt.s32.totalorder %s1582_s25, %s1575_s10 }
  0x49   : > { %p1579_p6 = pneg %p1578_p1  ;;  %p1585_p5 = por %p1584_p2, %p1583_p8 }
  0x4b   : > { %p1586_p4 = pnand %p1585_p5, %p1579_p6 }
  0x4d   : > { %1589 = shalt.err (!%p1586_p4)
}
  0x4e   : > { %s2542_s16 = smov 256   ;;  %287 = sbr.rel (%p1843_p12) target bundleno = 1005 (0x3ed), region = 32 }
  0x4f   : > { %1439 = dma.hbm_to_vmem [thread:$0]  (!%p1797_p0), %s1839_s27, 1024, %s1849_s0, %s257_s14, %s2542_s16, %s2542_s16, %s1680_s28  }
  0x50   : > { %s1883_s24 = sand.u32 (!%p1843_p12), 1, %s1660_s19   ;;  %p2543_p8 = scmp.ne.s32.totalorder (!%p1843_p12), %s2535_s30, 0 }
  0x51   : > { %s1393_s13 = sshll.u32 (!%p1843_p12), %s1883_s24, 6  ;;  %s290_s15 = scalar_lea.sflag (!%p1843_p12), [#allocation4], %s1883_s24 }
  0x52   : > { %s1887_s17 = scalar_lea.vmem (!%p1843_p12), [#allocation3], %s1393_s13 }
  0x55   : > { %1643 = dma.done.wait (%p2543_p8), %s290_s15, 1024  }
  0x56   : > { %1645 = vsyncadd (%p2543_p8), %s290_s15, 4294966272  ;;  %s299_s0 = scalar_lea.sflag [#allocation7], %s1883_s24  ;;  %s1894_s9 = scalar_lea.vmem [#allocation6], %s1393_s13 }
  0x57   : > { %1647 = dma.done.wait (%p2543_p8), %s299_s0, 1024  }
  0x58   : > { %1649 = vsyncadd (%p2543_p8), %s299_s0, 4294966272  ;;  %v428_v0 = vld [vmem:[%s1894_s9 + $0x8] sm:$0xff]  ;;  %v427_v1 = vld [vmem:[%s1894_s9] sm:$0xff]  ;;  %v615_v48 = vlaneseq  ;;  %p358_p0 = scmp.lt.s32.totalorder %s1668_s21, 1  ;;  %s1395_s14 = sshll.u32 %s1883_s24, 7  ;;  %vm1090_vm2 = vcmask 7168  }
  0x59   : > { %v436_v2 = vunpack.c.l.s8.bf16 %v428_v0  ;;  %v438_v3 = vunpack.c.h.s8.bf16 %v428_v0  ;;  %v435_v4 = vunpack.c.l.s8.bf16 %v427_v1  ;;  %v1903_v5 = vld [vmem:[%s1887_s17 + $0x8] sm:$0xff]  ;;  %v430_v9 = vld [vmem:[%s1894_s9 + $0x18] sm:$0xff]  ;;  %v437_v10 = vunpack.c.h.s8.bf16 %v427_v1  ;;  %v429_v12 = vld [vmem:[%s1894_s9 + $0x10] sm:$0xff]  ;;  %s2039_s10 = scalar_lea.vmem [#allocation8], %s1395_s14  ;;  %s1410_s13 = sshll.u32 %s1668_s21, 11 }
  0x5a   : > { %v1906_v6 = vld [vmem:[%s1887_s17 + $0x28] sm:$0xff]  ;;  %v412_v7 = vunpack.c.l.s8.bf16 %v1903_v5  ;;  %v440_v11 = vunpack.c.l.s8.bf16 %v430_v9  ;;  %v439_v13 = vunpack.c.l.s8.bf16 %v429_v12  ;;  %v442_v14 = vunpack.c.h.s8.bf16 %v430_v9  ;;  %v431_v18 = vld [vmem:[%s1894_s9 + $0x20] sm:$0xff]  ;;  %v434_v21 = vld [vmem:[%s1894_s9 + $0x38] sm:$0xff]  ;;  %s2009_s30 = scalar_select %p358_p0, %s1668_s21, 1 }
  0x5b   : > { %467 = vmatprep.subr.bf16.mxu0 %v436_v2  ;;  %1411 = vmatprep.subr.bf16.mxu1 %v436_v2  ;;  %v420_v8 = vunpack.c.l.s8.bf16 %v1906_v6  ;;  %v432_v15 = vld [vmem:[%s1894_s9 + $0x28] sm:$0xff]  ;;  %v441_v16 = vunpack.c.h.s8.bf16 %v429_v12  ;;  %v443_v19 = vunpack.c.l.s8.bf16 %v431_v18  ;;  %v445_v22 = vunpack.c.h.s8.bf16 %v431_v18  ;;  %v433_v24 = vld [vmem:[%s1894_s9 + $0x30] sm:$0xff]  ;;  %v403_v28 = vld [vmem:[%s1887_s17] sm:$0xff]  ;;  %s2417_s0 = scalar_lea.hbm %s2527_s3, %s1410_s13  ;;  %s1173_s9 = sshll.u32 %s2039_s10, 4  ;;  %s2420_s9 = int_to_ptr.vmem [resolvable:$true] %s1173_s9 }
  0x5c   : > { %468 = vmatpush1.bf16.xpose.msra.mxu0 %v435_v4  ;;  %1419 = vmatpush1.bf16.xpose.msra.mxu1 %v435_v4  ;;  %v444_v17 = vunpack.c.l.s8.bf16 %v432_v15  ;;  %v446_v20 = vunpack.c.h.s8.bf16 %v432_v15  ;;  %v448_v23 = vunpack.c.l.s8.bf16 %v434_v21  ;;  %v447_v25 = vunpack.c.l.s8.bf16 %v433_v24  ;;  %v407_v29 = vld [vmem:[%s1887_s17 + $0x20] sm:$0xff]  ;;  %v406_v34 = vld [vmem:[%s1887_s17 + $0x18] sm:$0xff]  ;;  %v405_v40 = vld [vmem:[%s1887_s17 + $0x10] sm:$0xff]  ;;  %s360_s29 = scalar_lea.vmem %s2526_s2, %s2009_s30  ;;  %s1408_s12 = sshll.u32 %s2009_s30, 7 }
  0x5d   : > { %469 = vmatprep.subr.bf16.mxu0 %v438_v3  ;;  %1412 = vmatprep.subr.bf16.mxu1 %v438_v3  ;;  %v450_v26 = vunpack.c.h.s8.bf16 %v434_v21  ;;  %v449_v27 = vunpack.c.h.s8.bf16 %v433_v24  ;;  %v411_v30 = vunpack.c.l.s8.bf16 %v403_v28  ;;  %v419_v31 = vunpack.c.l.s8.bf16 %v407_v29  ;;  %v410_v35 = vld [vmem:[%s1887_s17 + $0x38] sm:$0xff]  ;;  %v409_v41 = vld [vmem:[%s1887_s17 + $0x30] sm:$0xff]  ;;  %s2171_s16 = scalar_lea.vmem %s2528_s4, %s1408_s12  ;;  %s1140_s28 = scalar_lea.sflag [#allocation5], %s1883_s24 }
  0x5e   : > { %499 = vmatprep.mubr.bf16.mxu0 %v412_v7  ;;  %531 = vmatprep.mubr.bf16.mxu1 %v420_v8  ;;  %v414_v32 = vunpack.c.h.s8.bf16 %v1903_v5  ;;  %v422_v33 = vunpack.c.h.s8.bf16 %v1906_v6  ;;  %v413_v36 = vunpack.c.h.s8.bf16 %v403_v28  ;;  %v421_v37 = vunpack.c.h.s8.bf16 %v407_v29  ;;  %s1590_s27 = scalar_lea.vmem %s2420_s9, 2048  ;;  %p2544_p12 = scmp.ne.s32.totalorder %s2536_s6, 0 }
  0x5f   : > { %v416_v38 = vunpack.c.l.s8.bf16 %v406_v34  ;;  %v424_v39 = vunpack.c.l.s8.bf16 %v410_v35  ;;  %v415_v42 = vunpack.c.l.s8.bf16 %v405_v40  ;;  %v423_v43 = vunpack.c.l.s8.bf16 %v409_v41  ;;  %p1591_p3 = scmp.ne.s32.totalorder %s2420_s9, %s1590_s27 }
  0x60   : > { %v418_v44 = vunpack.c.h.s8.bf16 %v406_v34  ;;  %v426_v45 = vunpack.c.h.s8.bf16 %v410_v35  ;;  %v417_v46 = vunpack.c.h.s8.bf16 %v405_v40  ;;  %v425_v47 = vunpack.c.h.s8.bf16 %v409_v41  ;;  %v2015_v34 = vld [vmem:[%s360_s29] ss:$0 sm:$0xff]  ;;  %s1682_s29 = smov [#allocation8]  }
  0x61   : > { %v1924_v49 = vand.u32 127, %v615_v48  ;;  %p1592_p13 = pnand %p1591_p3, %p2544_p12  ;;  %s1594_s14 = sshll.u32 %s1682_s29, 4  ;;  %s1595_s14 = int_to_ptr.vmem [resolvable:$false] %s1594_s14 }
  0x62   : > { %s1596_s21 = scalar_lea.vmem %s1595_s14, 4096  ;;  %p1597_p10 = scmp.lt.s32.totalorder %s2420_s9, %s1595_s14 }
  0x63   : > { %vm617_vm0 = vcmp.eq.s32.totalorder %v1924_v49, 8  ;;  %vm785_vm1 = vcmp.lt.s32.totalorder %v1924_v49, 8  ;;  %p1593_p7 = pneg %p1592_p13  ;;  %p1598_p9 = scmp.lt.s32.totalorder %s1596_s21, %s1590_s27 }
  0x64   : > { %470 = vmatpush1.bf16.xpose.msra.mxu0 %v437_v10  ;;  %1420 = vmatpush1.bf16.xpose.msra.mxu1 %v437_v10 }
  0x65   : > { %471 = vmatprep.subr.bf16.mxu0 %v440_v11  ;;  %1413 = vmatprep.subr.bf16.mxu1 %v440_v11  ;;  %p1599_p11 = por %p1598_p9, %p1597_p10 }
  0x67   : > { %p1600_p1 = pnand %p1599_p11, %p1593_p7 }
  0x6c   : > { %472 = vmatpush1.bf16.xpose.msra.mxu0 %v439_v13  ;;  %1421 = vmatpush1.bf16.xpose.msra.mxu1 %v439_v13 }
  0x6d   : > { %473 = vmatprep.subr.bf16.mxu0 %v442_v14  ;;  %1414 = vmatprep.subr.bf16.mxu1 %v442_v14 }
  0x74   : > { %474 = vmatpush1.bf16.xpose.msra.mxu0 %v441_v16  ;;  %1422 = vmatpush1.bf16.xpose.msra.mxu1 %v441_v16 }
  0x75   : > { %475 = vmatprep.subr.bf16.mxu0 %v444_v17  ;;  %1415 = vmatprep.subr.bf16.mxu1 %v444_v17 }
  0x7c   : > { %476 = vmatpush1.bf16.xpose.msra.mxu0 %v443_v19  ;;  %1423 = vmatpush1.bf16.xpose.msra.mxu1 %v443_v19 }
  0x7d   : > { %477 = vmatprep.subr.bf16.mxu0 %v446_v20  ;;  %1416 = vmatprep.subr.bf16.mxu1 %v446_v20 }
  0x84   : > { %478 = vmatpush1.bf16.xpose.msra.mxu0 %v445_v22  ;;  %1424 = vmatpush1.bf16.xpose.msra.mxu1 %v445_v22 }
  0x85   : > { %479 = vmatprep.subr.bf16.mxu0 %v448_v23  ;;  %1417 = vmatprep.subr.bf16.mxu1 %v448_v23 }
  0x8c   : > { %480 = vmatpush1.bf16.xpose.msra.mxu0 %v447_v25  ;;  %1425 = vmatpush1.bf16.xpose.msra.mxu1 %v447_v25 }
  0x8d   : > { %481 = vmatprep.subr.bf16.mxu0 %v450_v26  ;;  %1418 = vmatprep.subr.bf16.mxu1 %v450_v26 }
  0x94   : > { %482 = vmatpush1.bf16.xpose.msra.mxu0 %v449_v27  ;;  %1426 = vmatpush1.bf16.xpose.msra.mxu1 %v449_v27 }
  0x9b   : > { %500 = vmatmul.mubr.bf16.vlgmr.msra.gmra.mrb[0].mxu0 %v411_v30  ;;  %532 = vmatmul.mubr.bf16.vlgmr.msra.gmra.mrb[0].mxu1 %v419_v31 }
  0x9c   : > { %507 = vmatprep.mubr.bf16.mxu0 %v414_v32  ;;  %539 = vmatprep.mubr.bf16.mxu1 %v422_v33 }
  0xa3   : > { %508 = vmatmul.mubr.bf16.gmra.mrb[4].mxu0 %v413_v36  ;;  %540 = vmatmul.mubr.bf16.gmra.mrb[4].mxu1 %v421_v37 }
  0xa4   : > { %515 = vmatprep.mubr.bf16.mxu0 %v416_v38  ;;  %547 = vmatprep.mubr.bf16.mxu1 %v424_v39 }
  0xab   : > { %516 = vmatmul.mubr.bf16.gmra.mrb[8].mxu0 %v415_v42  ;;  %548 = vmatmul.mubr.bf16.gmra.mrb[8].mxu1 %v423_v43 }
  0xac   : > { %523 = vmatprep.mubr.bf16.mxu0 %v418_v44  ;;  %555 = vmatprep.mubr.bf16.mxu1 %v426_v45 }
  0xb3   : > { %524 = vmatmul.mubr.bf16.gmra.mrb[12].mxu0 %v417_v46  ;;  %556 = vmatmul.mubr.bf16.gmra.mrb[12].mxu1 %v425_v47 }
 0x16e   : > { %v1927_v50 = vpop.f32.mrb[0].mxu0  ;;  %v1929_v51 = vpop.f32.mrb[0].mxu1 }
 0x16f   : > { %v503_v52 = vpop.f32.mrb[1].mxu0  ;;  %v535_v53 = vpop.f32.mrb[1].mxu1  ;;  %v618_v54 = vsel %vm617_vm0, %v1927_v50, 0.0  ;;  %v626_v59 = vsel %vm617_vm0, %v1929_v51, 0.0  ;;  %v667_v48 = vmul.f32 2.0, %v1927_v50 }
 0x170   : > { %v1934_v55 = vpop.f32.mrb[2].mxu1  ;;  %634 = vadd.xlane.f32.xlu0 %v618_v54  ;;  %v1936_v56 = vpop.f32.mrb[2].mxu0 }
 0x171   : > { %v506_v57 = vpop.f32.mrb[3].mxu0  ;;  %v538_v58 = vpop.f32.mrb[3].mxu1  ;;  %v627_v60 = vsel %vm617_vm0, %v1934_v55, 0.0  ;;  %v619_v63 = vsel %vm617_vm0, %v1936_v56, 0.0  ;;  %v676_v54 = vmul.f32 2.0, %v1934_v55 }
 0x172   : > { %652 = vadd.xlane.f32.xlu1 %v627_v60 }
 0x173   : > { %v692_v50 = vadd.f32 1.0, %v676_v54 }
 0x174   : > { %650 = vadd.xlane.f32.xlu0 %v626_v59 }
 0x176   : > { %v1944_v61 = vpop.f32.mrb[4].mxu0  ;;  %v1946_v62 = vpop.f32.mrb[4].mxu1 }
 0x177   : > { %v620_v0 = vsel %vm617_vm0, %v1944_v61, 0.0  ;;  %v511_v1 = vpop.f32.mrb[5].mxu0  ;;  %v543_v2 = vpop.f32.mrb[5].mxu1  ;;  %v628_v6 = vsel %vm617_vm0, %v1946_v62, 0.0 }
 0x178   : > { %636 = vadd.xlane.f32.xlu0 %v619_v63  ;;  %638 = vadd.xlane.f32.xlu1 %v620_v0  ;;  %v1954_v3 = vpop.f32.mrb[6].mxu0  ;;  %v1956_v4 = vpop.f32.mrb[6].mxu1  ;;  %v683_v63 = vadd.f32 1.0, %v667_v48  ;;  %v675_v0 = vmul.f32 2.0, %v1929_v51  ;;  %v668_v51 = vmul.f32 2.0, %v1936_v56 }
 0x179   : > { %v514_v5 = vpop.f32.mrb[7].mxu0  ;;  %v621_v7 = vsel %vm617_vm0, %v1954_v3, 0.0  ;;  %v546_v8 = vpop.f32.mrb[7].mxu1  ;;  %v629_v9 = vsel %vm617_vm0, %v1956_v4, 0.0  ;;  %v678_v48 = vmul.f32 2.0, %v1956_v4 }
 0x17c   : > { %654 = vadd.xlane.f32.xlu0 %v628_v6  ;;  %640 = vadd.xlane.f32.xlu1 %v621_v7 }
 0x17e   : > { %v1967_v10 = vpop.f32.mrb[8].mxu0  ;;  %v1969_v11 = vpop.f32.mrb[8].mxu1 }
 0x17f   : > { %v622_v12 = vsel %vm617_vm0, %v1967_v10, 0.0  ;;  %v519_v13 = vpop.f32.mrb[9].mxu0  ;;  %v551_v14 = vpop.f32.mrb[9].mxu1  ;;  %v630_v17 = vsel %vm617_vm0, %v1969_v11, 0.0  ;;  %v671_v54 = vmul.f32 2.0, %v1967_v10 }
 0x180   : > { %656 = vadd.xlane.f32.xlu1 %v629_v9  ;;  %642 = vadd.xlane.f32.xlu0 %v622_v12  ;;  %v1974_v15 = vpop.f32.mrb[10].mxu0  ;;  %v1976_v16 = vpop.f32.mrb[10].mxu1  ;;  %v691_v13 = vadd.f32 1.0, %v675_v0  ;;  %v679_v0 = vmul.f32 2.0, %v1969_v11  ;;  %v694_v11 = vadd.f32 1.0, %v678_v48 }
 0x181   : > { %v623_v18 = vsel %vm617_vm0, %v1974_v15, 0.0  ;;  %v522_v19 = vpop.f32.mrb[11].mxu0  ;;  %v554_v20 = vpop.f32.mrb[11].mxu1  ;;  %v631_v21 = vsel %vm617_vm0, %v1976_v16, 0.0 }
 0x184   : > { %658 = vadd.xlane.f32.xlu0 %v630_v17  ;;  %644 = vadd.xlane.f32.xlu1 %v623_v18  ;;  %v669_v18 = vmul.f32 2.0, %v1944_v61 }
 0x186   : > { %v1987_v22 = vpop.f32.mrb[12].mxu0  ;;  %v1989_v23 = vpop.f32.mrb[12].mxu1 }
 0x187   : > { %v624_v24 = vsel %vm617_vm0, %v1987_v22, 0.0  ;;  %v527_v25 = vpop.f32.mrb[13].mxu0  ;;  %v559_v26 = vpop.f32.mrb[13].mxu1  ;;  %v632_v29 = vsel %vm617_vm0, %v1989_v23, 0.0 }
 0x188   : > { %660 = vadd.xlane.f32.xlu1 %v631_v21  ;;  %646 = vadd.xlane.f32.xlu0 %v624_v24  ;;  %v1994_v27 = vpop.f32.mrb[14].mxu0  ;;  %v1996_v28 = vpop.f32.mrb[14].mxu1 }
 0x189   : > { %v625_v30 = vsel %vm617_vm0, %v1994_v27, 0.0  ;;  %v530_v31 = vpop.f32.mrb[15].mxu0  ;;  %v562_v32 = vpop.f32.mrb[15].mxu1  ;;  %v633_v33 = vsel %vm617_vm0, %v1996_v28, 0.0 }
 0x18a   : > { %v684_v31 = vadd.f32 1.0, %v668_v51  ;;  %v677_v32 = vmul.f32 2.0, %v1946_v62 }
 0x18c   : > { %662 = vadd.xlane.f32.xlu0 %v632_v29  ;;  %648 = vadd.xlane.f32.xlu1 %v625_v30 }
 0x190   : > { %664 = vadd.xlane.f32.xlu1 %v633_v33 }
 0x1fd   : > { %v635_v35 = vpop.xlane.xlu0 %634 }
 0x1fe   : > { %v705_v36 = vadd.f32 %v2015_v34, %v635_v35 }
 0x1ff   : > { %v653_v38 = vpop.xlane.xlu1 %652 }
 0x200   : > { %v721_v37 = vadd.f32 1.0, %v705_v36  ;;  %v714_v39 = vadd.f32 %v2015_v34, %v653_v38  ;;  %v685_v36 = vadd.f32 1.0, %v669_v18 }
 0x201   : > { %v651_v40 = vpop.xlane.xlu0 %650 }
 0x202   : > { %1498 = vrcp.f32 %v721_v37  ;;  %v713_v41 = vadd.f32 %v2015_v34, %v651_v40  ;;  %v730_v42 = vadd.f32 1.0, %v714_v39 }
 0x204   : > { %v729_v43 = vadd.f32 1.0, %v713_v41  ;;  %1500 = vrcp.f32 %v730_v42  ;;  %v670_v41 = vmul.f32 2.0, %v1954_v3  ;;  %v693_v3 = vadd.f32 1.0, %v677_v32 }
 0x205   : > { %v637_v44 = vpop.xlane.xlu0 %636  ;;  %v639_v45 = vpop.xlane.xlu1 %638 }
 0x206   : > { %1502 = vrcp.f32 %v729_v43  ;;  %v706_v46 = vadd.f32 %v2015_v34, %v637_v44  ;;  %v707_v47 = vadd.f32 %v2015_v34, %v639_v45 }
 0x208   : > { %v722_v52 = vadd.f32 1.0, %v706_v46  ;;  %v723_v53 = vadd.f32 1.0, %v707_v47 }
 0x209   : > { %v655_v57 = vpop.xlane.xlu0 %654  ;;  %v641_v58 = vpop.xlane.xlu1 %640 }
 0x20a   : > { %1504 = vrcp.f32 %v722_v52  ;;  %v715_v59 = vadd.f32 %v2015_v34, %v655_v57  ;;  %v708_v60 = vadd.f32 %v2015_v34, %v641_v58 }
 0x20b   : > { %1506 = vrcp.f32 %v723_v53 }
 0x20c   : > { %v1499_v1 = vpop.eup %1498  ;;  %v731_v2 = vadd.f32 1.0, %v715_v59  ;;  %v724_v5 = vadd.f32 1.0, %v708_v60 }
 0x20d   : > { %v657_v6 = vpop.xlane.xlu1 %656  ;;  %v643_v7 = vpop.xlane.xlu0 %642  ;;  %v738_v8 = vmul.f32 %v1499_v1, %v683_v63  ;;  %v686_v63 = vadd.f32 1.0, %v670_v41 }
 0x20e   : > { %1508 = vrcp.f32 %v731_v2  ;;  %v716_v55 = vadd.f32 %v2015_v34, %v657_v6  ;;  %v709_v9 = vadd.f32 %v2015_v34, %v643_v7  ;;  %v1501_v12 = vpop.eup %1500 }
 0x20f   : > { %1510 = vrcp.f32 %v724_v5  ;;  %v769_v14 = vsub.f32 1.0, %v738_v8  ;;  %v756_v21 = vmul.f32 %v1501_v12, %v692_v50  ;;  %v672_v12 = vmul.f32 2.0, %v1974_v15 }
 0x210   : > { %v1503_v17 = vpop.eup %1502  ;;  %v732_v19 = vadd.f32 1.0, %v716_v55  ;;  %v725_v20 = vadd.f32 1.0, %v709_v9  ;;  %v687_v9 = vadd.f32 1.0, %v671_v54 }
 0x211   : > { %v659_v24 = vpop.xlane.xlu0 %658  ;;  %v645_v25 = vpop.xlane.xlu1 %644  ;;  %v2035_v26 = vsel %vm785_vm1, %v769_v14, inf  ;;  %v754_v29 = vmul.f32 %v1503_v17, %v691_v13  ;;  %v778_v61 = vsub.f32 1.0, %v756_v21  ;;  %v695_v21 = vadd.f32 1.0, %v679_v0 }
 0x212   : > { %1512 = vrcp.f32 %v732_v19  ;;  %v717_v30 = vadd.f32 %v2015_v34, %v659_v24  ;;  %v710_v56 = vadd.f32 %v2015_v34, %v645_v25  ;;  %1123 = vst [vmem:[%s2039_s10] sm:$0xff] %v2035_v26  ;;  %802 = vmin.xlane.f32.xlu0 %v2035_v26  ;;  %v680_v25 = vmul.f32 2.0, %v1976_v16 }
 0x213   : > { %1514 = vrcp.f32 %v725_v20  ;;  %v777_v33 = vsub.f32 1.0, %v754_v29  ;;  %v2047_v39 = vsel %vm785_vm1, %v778_v61, inf  ;;  %v688_v61 = vadd.f32 1.0, %v672_v12 }
 0x214   : > { %v1505_v35 = vpop.eup %1504  ;;  %v733_v37 = vadd.f32 1.0, %v717_v30  ;;  %v726_v38 = vadd.f32 1.0, %v710_v56  ;;  %1132 = vst [vmem:[%s2039_s10 + $0x48] sm:$0xff] %v2047_v39 }
 0x215   : > { %v1507_v40 = vpop.eup %1506  ;;  %v661_v42 = vpop.xlane.xlu1 %660  ;;  %v2052_v44 = vsel %vm785_vm1, %v777_v33, inf  ;;  %v740_v62 = vmul.f32 %v1505_v35, %v684_v31 }
 0x216   : > { %v647_v43 = vpop.xlane.xlu0 %646  ;;  %1516 = vrcp.f32 %v733_v37  ;;  %v718_v45 = vadd.f32 %v2015_v34, %v661_v42  ;;  %1131 = vst [vmem:[%s2039_s10 + $0x40] sm:$0xff] %v2052_v44  ;;  %818 = vmin.xlane.f32.xlu0 %v2052_v44  ;;  %v742_v47 = vmul.f32 %v1507_v40, %v685_v36  ;;  %v696_v37 = vadd.f32 1.0, %v680_v25 }
 0x217   : > { %v711_v46 = vadd.f32 %v2015_v34, %v647_v43  ;;  %1518 = vrcp.f32 %v726_v38  ;;  %v770_v52 = vsub.f32 1.0, %v740_v62  ;;  %v681_v38 = vmul.f32 2.0, %v1989_v23 }
 0x218   : > { %v1509_v53 = vpop.eup %1508  ;;  %v734_v57 = vadd.f32 1.0, %v718_v45  ;;  %v771_v59 = vsub.f32 1.0, %v742_v47  ;;  %v674_v43 = vmul.f32 2.0, %v1994_v27  ;;  %v682_v27 = vmul.f32 2.0, %v1996_v28 }
 0x219   : > { %v727_v58 = vadd.f32 1.0, %v711_v46  ;;  %v1511_v60 = vpop.eup %1510  ;;  %v649_v2 = vpop.xlane.xlu1 %648  ;;  %v2066_v5 = vsel %vm785_vm1, %v770_v52, inf  ;;  %v758_v4 = vmul.f32 %v1509_v53, %v693_v3  ;;  %v697_v48 = vadd.f32 1.0, %v681_v38 }
 0x21a   : > { %v663_v1 = vpop.xlane.xlu0 %662  ;;  %1520 = vrcp.f32 %v734_v57  ;;  %v712_v10 = vadd.f32 %v2015_v34, %v649_v2  ;;  %v2072_v6 = vsel %vm785_vm1, %v771_v59, inf  ;;  %1124 = vst [vmem:[%s2039_s10 + $0x8] sm:$0xff] %v2066_v5  ;;  %804 = vmin.xlane.f32.xlu1 %v2066_v5  ;;  %v744_v8 = vmul.f32 %v1511_v60, %v686_v63 }
 0x21b   : > { %v719_v50 = vadd.f32 %v2015_v34, %v663_v1  ;;  %1522 = vrcp.f32 %v727_v58  ;;  %1125 = vst [vmem:[%s2039_s10 + $0x10] sm:$0xff] %v2072_v6  ;;  %806 = vmin.xlane.f32.xlu0 %v2072_v6  ;;  %v779_v7 = vsub.f32 1.0, %v758_v4  ;;  %v690_v54 = vadd.f32 1.0, %v674_v43 }
 0x21c   : > { %v1513_v55 = vpop.eup %1512  ;;  %v728_v51 = vadd.f32 1.0, %v712_v10  ;;  %v772_v19 = vsub.f32 1.0, %v744_v8  ;;  %v698_v0 = vadd.f32 1.0, %v682_v27 }
 0x21d   : > { %v735_v13 = vadd.f32 1.0, %v719_v50  ;;  %v1515_v14 = vpop.eup %1514  ;;  %v665_v17 = vpop.xlane.xlu1 %664  ;;  %v2083_v18 = vsel %vm785_vm1, %v779_v7, inf  ;;  %v760_v20 = vmul.f32 %v1513_v55, %v694_v11 }
 0x21e   : > { %v720_v24 = vadd.f32 %v2015_v34, %v665_v17  ;;  %1133 = vst [vmem:[%s2039_s10 + $0x50] sm:$0xff] %v2083_v18  ;;  %820 = vmin.xlane.f32.xlu1 %v2047_v39  ;;  %v746_v15 = vmul.f32 %v1515_v14, %v687_v9  ;;  %v2093_v29 = vsel %vm785_vm1, %v772_v19, inf  ;;  %v673_v34 = vmul.f32 2.0, %v1987_v22 }
 0x21f   : > { %1524 = vrcp.f32 %v735_v13  ;;  %822 = vmin.xlane.f32.xlu0 %v2083_v18  ;;  %v780_v30 = vsub.f32 1.0, %v760_v20  ;;  %1126 = vst [vmem:[%s2039_s10 + $0x18] sm:$0xff] %v2093_v29 }
 0x220   : > { %1526 = vrcp.f32 %v728_v51  ;;  %v1517_v56 = vpop.eup %1516  ;;  %v736_v31 = vadd.f32 1.0, %v720_v24  ;;  %v773_v32 = vsub.f32 1.0, %v746_v15  ;;  %v689_v42 = vadd.f32 1.0, %v673_v34 }
 0x221   : > { %v1519_v33 = vpop.eup %1518  ;;  %v762_v16 = vmul.f32 %v1517_v56, %v695_v21  ;;  %v2100_v35 = vsel %vm785_vm1, %v780_v30, inf }
 0x222   : > { %1528 = vrcp.f32 %v736_v31  ;;  %v2104_v36 = vsel %vm785_vm1, %v773_v32, inf  ;;  %808 = vmin.xlane.f32.xlu1 %v2093_v29  ;;  %1134 = vst [vmem:[%s2039_s10 + $0x58] sm:$0xff] %v2100_v35  ;;  %v748_v22 = vmul.f32 %v1519_v33, %v688_v61 }
 0x223   : > { %1127 = vst [vmem:[%s2039_s10 + $0x20] sm:$0xff] %v2104_v36  ;;  %810 = vmin.xlane.f32.xlu0 %v2104_v36  ;;  %v781_v40 = vsub.f32 1.0, %v762_v16 }
 0x224   : > { %v1521_v41 = vpop.eup %1520  ;;  %v774_v62 = vsub.f32 1.0, %v748_v22 }
 0x225   : > { %v1523_v45 = vpop.eup %1522  ;;  %v2116_v46 = vsel %vm785_vm1, %v781_v40, inf  ;;  %v764_v47 = vmul.f32 %v1521_v41, %v696_v37 }
 0x226   : > { %1135 = vst [vmem:[%s2039_s10 + $0x60] sm:$0xff] %v2116_v46  ;;  %824 = vmin.xlane.f32.xlu1 %v2100_v35  ;;  %v750_v23 = vmul.f32 %v1523_v45, %v689_v42  ;;  %v2123_v3 = vsel %vm785_vm1, %v774_v62, inf }
 0x227   : > { %826 = vmin.xlane.f32.xlu0 %v2116_v46  ;;  %1128 = vst [vmem:[%s2039_s10 + $0x28] sm:$0xff] %v2123_v3  ;;  %v782_v52 = vsub.f32 1.0, %v764_v47 }
 0x228   : > { %v775_v57 = vsub.f32 1.0, %v750_v23 }
 0x229   : > { %v1525_v53 = vpop.eup %1524  ;;  %v2131_v60 = vsel %vm785_vm1, %v782_v52, inf }
 0x22a   : > { %v1527_v58 = vpop.eup %1526  ;;  %v766_v59 = vmul.f32 %v1525_v53, %v697_v48  ;;  %v2135_v63 = vsel %vm785_vm1, %v775_v57, inf  ;;  %812 = vmin.xlane.f32.xlu1 %v2123_v3  ;;  %1136 = vst [vmem:[%s2039_s10 + $0x68] sm:$0xff] %v2131_v60 }
 0x22b   : > { %v752_v28 = vmul.f32 %v1527_v58, %v690_v54  ;;  %814 = vmin.xlane.f32.xlu0 %v2135_v63  ;;  %1129 = vst [vmem:[%s2039_s10 + $0x30] sm:$0xff] %v2135_v63 }
 0x22c   : > { %v783_v1 = vsub.f32 1.0, %v766_v59  ;;  %v1529_v2 = vpop.eup %1528 }
 0x22d   : > { %v776_v4 = vsub.f32 1.0, %v752_v28  ;;  %v768_v10 = vmul.f32 %v1529_v2, %v698_v0 }
 0x22e   : > { %v2145_v50 = vsel %vm785_vm1, %v783_v1, inf  ;;  %828 = vmin.xlane.f32.xlu1 %v2131_v60 }
 0x22f   : > { %1137 = vst [vmem:[%s2039_s10 + $0x70] sm:$0xff] %v2145_v50  ;;  %v2152_v11 = vsel %vm785_vm1, %v776_v4, inf  ;;  %830 = vmin.xlane.f32.xlu0 %v2145_v50  ;;  %v784_v7 = vsub.f32 1.0, %v768_v10 }
 0x230   : > { %1130 = vst [vmem:[%s2039_s10 + $0x38] sm:$0xff] %v2152_v11 }
 0x231   : > { %v2159_v8 = vsel %vm785_vm1, %v784_v7, inf }
 0x232   : > { %816 = vmin.xlane.f32.xlu1 %v2152_v11  ;;  %1138 = vst [vmem:[%s2039_s10 + $0x78] sm:$0xff] %v2159_v8 }
 0x236   : > { %832 = vmin.xlane.f32.xlu1 %v2159_v8 }
 0x29f   : > { %v803_v55 = vpop.xlane.xlu0 %802 }
 0x2a0   : > { %vm834_vm3 = vcmp.eq.f32.partialorder %v2035_v26, %v803_v55  ;;  %1091 = vst.msk [vmem:[%s2171_s16] sm:$0xff] %vm1090_vm2, %v803_v55 }
 0x2a1   : > { %v2177_v9 = vsel %vm834_vm3, %v1924_v49, 128 }
 0x2a2   : > { %v867_v12 = vshra.s32 %v2177_v9, 16 }
 0x2a3   : > { %v819_v13 = vpop.xlane.xlu0 %818 }
 0x2a4   : > { %vm842_vm4 = vcmp.eq.f32.partialorder %v2052_v44, %v819_v13  ;;  %1099 = vst.msk [vmem:[%s2171_s16 + $0x40] sm:$0xff] %vm1090_vm2, %v819_v13  ;;  %v2183_v51 = vcvt.s32.f32 %v867_v12  ;;  %v866_v13 = vand.u32 65535, %v2177_v9 }
 0x2a5   : > { %v2186_v14 = vsel %vm842_vm4, %v1924_v49, 128 }
 0x2a6   : > { %870 = vmin.xlane.f32.xlu0 %v2183_v51  ;;  %v979_v26 = vshra.s32 %v2186_v14, 16 }
 0x2a7   : > { %v805_v17 = vpop.xlane.xlu1 %804 }
 0x2a8   : > { %v807_v19 = vpop.xlane.xlu0 %806  ;;  %vm835_vm5 = vcmp.eq.f32.partialorder %v2066_v5, %v805_v17  ;;  %1092 = vst.msk [vmem:[%s2171_s16 + $0x8] sm:$0xff] %vm1090_vm2, %v805_v17  ;;  %v2193_v44 = vcvt.s32.f32 %v979_v26  ;;  %v978_v17 = vand.u32 65535, %v2186_v14 }
 0x2a9   : > { %vm836_vm6 = vcmp.eq.f32.partialorder %v2072_v6, %v807_v19  ;;  %1093 = vst.msk [vmem:[%s2171_s16 + $0x10] sm:$0xff] %vm1090_vm2, %v807_v19  ;;  %v2199_v20 = vsel %vm835_vm5, %v1924_v49, 128 }
 0x2aa   : > { %v2202_v21 = vsel %vm836_vm6, %v1924_v49, 128  ;;  %982 = vmin.xlane.f32.xlu0 %v2193_v44  ;;  %v881_v24 = vshra.s32 %v2199_v20, 16 }
 0x2ab   : > { %v821_v5 = vpop.xlane.xlu1 %820  ;;  %v895_v15 = vshra.s32 %v2202_v21, 16  ;;  %v894_v9 = vand.u32 65535, %v2202_v21 }
 0x2ac   : > { %v823_v25 = vpop.xlane.xlu0 %822  ;;  %vm843_vm7 = vcmp.eq.f32.partialorder %v2047_v39, %v821_v5  ;;  %1100 = vst.msk [vmem:[%s2171_s16 + $0x48] sm:$0xff] %vm1090_vm2, %v821_v5  ;;  %v2210_v6 = vcvt.s32.f32 %v881_v24  ;;  %v980_v24 = vcvt.s32.f32 %v978_v17  ;;  %v880_v5 = vand.u32 65535, %v2199_v20 }
 0x2ad   : > { %vm844_vm8 = vcmp.eq.f32.partialorder %v2083_v18, %v823_v25  ;;  %1101 = vst.msk [vmem:[%s2171_s16 + $0x50] sm:$0xff] %vm1090_vm2, %v823_v25  ;;  %v2216_v30 = vsel %vm843_vm7, %v1924_v49, 128  ;;  %v2218_v56 = vcvt.s32.f32 %v895_v15 }
 0x2ae   : > { %v2221_v61 = vsel %vm844_vm8, %v1924_v49, 128  ;;  %884 = vmin.xlane.f32.xlu1 %v2210_v6  ;;  %v993_v39 = vshra.s32 %v2216_v30, 16  ;;  %v882_v14 = vcvt.s32.f32 %v880_v5 }
 0x2af   : > { %898 = vmin.xlane.f32.xlu0 %v2218_v56  ;;  %v809_v34 = vpop.xlane.xlu1 %808  ;;  %v1007_v31 = vshra.s32 %v2221_v61, 16  ;;  %v1006_v20 = vand.u32 65535, %v2221_v61 }
 0x2b0   : > { %v811_v18 = vpop.xlane.xlu0 %810  ;;  %vm837_vm9 = vcmp.eq.f32.partialorder %v2093_v29, %v809_v34  ;;  %1094 = vst.msk [vmem:[%s2171_s16 + $0x18] sm:$0xff] %vm1090_vm2, %v809_v34  ;;  %v2230_v32 = vcvt.s32.f32 %v993_v39  ;;  %v992_v39 = vand.u32 65535, %v2216_v30  ;;  %v896_v34 = vcvt.s32.f32 %v894_v9 }
 0x2b1   : > { %vm838_vm10 = vcmp.eq.f32.partialorder %v2104_v36, %v811_v18  ;;  %1095 = vst.msk [vmem:[%s2171_s16 + $0x20] sm:$0xff] %vm1090_vm2, %v811_v18  ;;  %v2236_v33 = vsel %vm837_vm9, %v1924_v49, 128  ;;  %v2238_v16 = vcvt.s32.f32 %v1007_v31 }
 0x2b2   : > { %v2241_v22 = vsel %vm838_vm10, %v1924_v49, 128  ;;  %996 = vmin.xlane.f32.xlu1 %v2230_v32  ;;  %v909_v29 = vshra.s32 %v2236_v33, 16  ;;  %v994_v18 = vcvt.s32.f32 %v992_v39  ;;  %v908_v30 = vand.u32 65535, %v2236_v33 }
 0x2b3   : > { %1010 = vmin.xlane.f32.xlu0 %v2238_v16  ;;  %v825_v37 = vpop.xlane.xlu1 %824  ;;  %v923_v38 = vshra.s32 %v2241_v22, 16 }
 0x2b4   : > { %v827_v36 = vpop.xlane.xlu0 %826  ;;  %vm845_vm11 = vcmp.eq.f32.partialorder %v2100_v35, %v825_v37  ;;  %1102 = vst.msk [vmem:[%s2171_s16 + $0x58] sm:$0xff] %vm1090_vm2, %v825_v37  ;;  %v2250_v40 = vcvt.s32.f32 %v909_v29  ;;  %v1008_v37 = vcvt.s32.f32 %v1006_v20 }
 0x2b5   : > { %vm846_vm12 = vcmp.eq.f32.partialorder %v2116_v46, %v827_v36  ;;  %1103 = vst.msk [vmem:[%s2171_s16 + $0x60] sm:$0xff] %vm1090_vm2, %v827_v36  ;;  %v2256_v41 = vsel %vm845_vm11, %v1924_v49, 128  ;;  %v2258_v42 = vcvt.s32.f32 %v923_v38  ;;  %v910_v36 = vcvt.s32.f32 %v908_v30 }
 0x2b6   : > { %v2261_v43 = vsel %vm846_vm12, %v1924_v49, 128  ;;  %912 = vmin.xlane.f32.xlu1 %v2250_v40  ;;  %v1021_v35 = vshra.s32 %v2256_v41, 16  ;;  %v1020_v33 = vand.u32 65535, %v2256_v41 }
 0x2b7   : > { %926 = vmin.xlane.f32.xlu0 %v2258_v42  ;;  %v813_v62 = vpop.xlane.xlu1 %812  ;;  %v1035_v45 = vshra.s32 %v2261_v43, 16 }
 0x2b8   : > { %v815_v46 = vpop.xlane.xlu0 %814  ;;  %vm839_vm13 = vcmp.eq.f32.partialorder %v2123_v3, %v813_v62  ;;  %1096 = vst.msk [vmem:[%s2171_s16 + $0x28] sm:$0xff] %vm1090_vm2, %v813_v62  ;;  %v2270_v47 = vcvt.s32.f32 %v1021_v35 }
 0x2b9   : > { %vm840_vm14 = vcmp.eq.f32.partialorder %v2135_v63, %v815_v46  ;;  %1097 = vst.msk [vmem:[%s2171_s16 + $0x30] sm:$0xff] %vm1090_vm2, %v815_v46  ;;  %v2276_v23 = vsel %vm839_vm13, %v1924_v49, 128  ;;  %v2278_v48 = vcvt.s32.f32 %v1035_v45  ;;  %v1022_v46 = vcvt.s32.f32 %v1020_v33 }
 0x2ba   : > { %v2281_v27 = vsel %vm840_vm14, %v1924_v49, 128  ;;  %1024 = vmin.xlane.f32.xlu1 %v2270_v47  ;;  %v937_v3 = vshra.s32 %v2276_v23, 16  ;;  %v936_v41 = vand.u32 65535, %v2276_v23 }
 0x2bb   : > { %1038 = vmin.xlane.f32.xlu0 %v2278_v48  ;;  %v829_v52 = vpop.xlane.xlu1 %828  ;;  %v951_v53 = vshra.s32 %v2281_v27, 16 }
 0x2bc   : > { %v831_v54 = vpop.xlane.xlu0 %830  ;;  %vm847_vm15 = vcmp.eq.f32.partialorder %v2131_v60, %v829_v52  ;;  %1104 = vst.msk [vmem:[%s2171_s16 + $0x68] sm:$0xff] %vm1090_vm2, %v829_v52  ;;  %v2290_v57 = vcvt.s32.f32 %v937_v3 }
 0x2bd   : > { %vm848_vm0 = vcmp.eq.f32.partialorder %v2145_v50, %v831_v54  ;;  %1105 = vst.msk [vmem:[%s2171_s16 + $0x70] sm:$0xff] %vm1090_vm2, %v831_v54  ;;  %v2296_v58 = vsel %vm847_vm15, %v1924_v49, 128  ;;  %v2298_v59 = vcvt.s32.f32 %v951_v53  ;;  %v938_v54 = vcvt.s32.f32 %v936_v41 }
 0x2be   : > { %v2301_v63 = vsel %vm848_vm0, %v1924_v49, 128  ;;  %940 = vmin.xlane.f32.xlu1 %v2290_v57  ;;  %v1049_v60 = vshra.s32 %v2296_v58, 16  ;;  %v1048_v23 = vand.u32 65535, %v2296_v58 }
 0x2bf   : > { %954 = vmin.xlane.f32.xlu0 %v2298_v59  ;;  %v817_v28 = vpop.xlane.xlu1 %816  ;;  %v1063_v0 = vshra.s32 %v2301_v63, 16 }
 0x2c0   : > { %vm841_vm1 = vcmp.eq.f32.partialorder %v2152_v11, %v817_v28  ;;  %1098 = vst.msk [vmem:[%s2171_s16 + $0x38] sm:$0xff] %vm1090_vm2, %v817_v28  ;;  %v2310_v1 = vcvt.s32.f32 %v1049_v60 }
 0x2c1   : > { %v2313_v2 = vsel %vm841_vm1, %v1924_v49, 128  ;;  %v2315_v4 = vcvt.s32.f32 %v1063_v0 }
 0x2c2   : > { %1052 = vmin.xlane.f32.xlu1 %v2310_v1  ;;  %v965_v50 = vshra.s32 %v2313_v2, 16  ;;  %v964_v58 = vand.u32 65535, %v2313_v2 }
 0x2c3   : > { %1066 = vmin.xlane.f32.xlu0 %v2315_v4  ;;  %v833_v10 = vpop.xlane.xlu1 %832 }
 0x2c4   : > { %vm849_vm3 = vcmp.eq.f32.partialorder %v2159_v8, %v833_v10  ;;  %1106 = vst.msk [vmem:[%s2171_s16 + $0x78] sm:$0xff] %vm1090_vm2, %v833_v10  ;;  %v2323_v11 = vcvt.s32.f32 %v965_v50  ;;  %v868_v8 = vcvt.s32.f32 %v866_v13  ;;  %v1050_v50 = vcvt.s32.f32 %v1048_v23 }
 0x2c5   : > { %v2326_v7 = vsel %vm849_vm3, %v1924_v49, 128  ;;  %v966_v13 = vcvt.s32.f32 %v964_v58 }
 0x2c6   : > { %968 = vmin.xlane.f32.xlu1 %v2323_v11  ;;  %v1077_v55 = vshra.s32 %v2326_v7, 16  ;;  %v1076_v2 = vand.u32 65535, %v2326_v7 }
 0x2c8   : > { %v2330_v12 = vcvt.s32.f32 %v1077_v55 }
 0x2ca   : > { %1080 = vmin.xlane.f32.xlu1 %v2330_v12 }
 0x333   : > { %v2334_v26 = vpop.xlane.xlu0 %870 }
 0x334   : > { %vm872_vm4 = vcmp.eq.f32.partialorder %v2183_v51, %v2334_v26 }
 0x335   : > { %v873_v49 = vsel %vm872_vm4, %v868_v8, inf }
 0x336   : > { %874 = vmin.xlane.f32.xlu0 %v873_v49 }
 0x337   : > { %v2339_v19 = vpop.xlane.xlu0 %982 }
 0x338   : > { %vm984_vm5 = vcmp.eq.f32.partialorder %v2193_v44, %v2339_v19 }
 0x339   : > { %v985_v15 = vsel %vm984_vm5, %v980_v24, inf }
 0x33a   : > { %986 = vmin.xlane.f32.xlu0 %v985_v15 }
 0x33b   : > { %v2345_v25 = vpop.xlane.xlu1 %884 }
 0x33c   : > { %v2348_v51 = vpop.xlane.xlu0 %898  ;;  %vm886_vm6 = vcmp.eq.f32.partialorder %v2210_v6, %v2345_v25  ;;  %v922_v6 = vand.u32 65535, %v2241_v22 }
 0x33d   : > { %vm900_vm7 = vcmp.eq.f32.partialorder %v2218_v56, %v2348_v51  ;;  %v887_v44 = vsel %vm886_vm6, %v882_v14, inf }
 0x33e   : > { %v901_v21 = vsel %vm900_vm7, %v896_v34, inf  ;;  %888 = vmin.xlane.f32.xlu1 %v887_v44  ;;  %v924_v62 = vcvt.s32.f32 %v922_v6 }
 0x33f   : > { %902 = vmin.xlane.f32.xlu0 %v901_v21  ;;  %v2355_v31 = vpop.xlane.xlu1 %996 }
 0x340   : > { %v2358_v29 = vpop.xlane.xlu0 %1010  ;;  %vm998_vm8 = vcmp.eq.f32.partialorder %v2230_v32, %v2355_v31  ;;  %v1034_v32 = vand.u32 65535, %v2261_v43 }
 0x341   : > { %vm1012_vm9 = vcmp.eq.f32.partialorder %v2238_v16, %v2358_v29  ;;  %v999_v56 = vsel %vm998_vm8, %v994_v18, inf }
 0x342   : > { %v1013_v61 = vsel %vm1012_vm9, %v1008_v37, inf  ;;  %1000 = vmin.xlane.f32.xlu1 %v999_v56  ;;  %v1036_v52 = vcvt.s32.f32 %v1034_v32 }
 0x343   : > { %1014 = vmin.xlane.f32.xlu0 %v1013_v61  ;;  %v2365_v38 = vpop.xlane.xlu1 %912 }
 0x344   : > { %v2368_v35 = vpop.xlane.xlu0 %926  ;;  %vm914_vm10 = vcmp.eq.f32.partialorder %v2250_v40, %v2365_v38  ;;  %v950_v40 = vand.u32 65535, %v2281_v27 }
 0x345   : > { %vm928_vm11 = vcmp.eq.f32.partialorder %v2258_v42, %v2368_v35  ;;  %v915_v16 = vsel %vm914_vm10, %v910_v36, inf }
 0x346   : > { %v929_v22 = vsel %vm928_vm11, %v924_v62, inf  ;;  %916 = vmin.xlane.f32.xlu1 %v915_v16  ;;  %v952_v28 = vcvt.s32.f32 %v950_v40 }
 0x347   : > { %930 = vmin.xlane.f32.xlu0 %v929_v22  ;;  %v2375_v45 = vpop.xlane.xlu1 %1024 }
 0x348   : > { %v2378_v3 = vpop.xlane.xlu0 %1038  ;;  %vm1026_vm12 = vcmp.eq.f32.partialorder %v2270_v47, %v2375_v45  ;;  %v1062_v47 = vand.u32 65535, %v2301_v63 }
 0x349   : > { %vm1040_vm13 = vcmp.eq.f32.partialorder %v2278_v48, %v2378_v3  ;;  %v1027_v42 = vsel %vm1026_vm12, %v1022_v46, inf }
 0x34a   : > { %v1041_v43 = vsel %vm1040_vm13, %v1036_v52, inf  ;;  %1028 = vmin.xlane.f32.xlu1 %v1027_v42  ;;  %v1064_v55 = vcvt.s32.f32 %v1062_v47 }
 0x34b   : > { %1042 = vmin.xlane.f32.xlu0 %v1041_v43  ;;  %v2385_v53 = vpop.xlane.xlu1 %940 }
 0x34c   : > { %v2388_v60 = vpop.xlane.xlu0 %954  ;;  %vm942_vm14 = vcmp.eq.f32.partialorder %v2290_v57, %v2385_v53 }
 0x34d   : > { %vm956_vm15 = vcmp.eq.f32.partialorder %v2298_v59, %v2388_v60  ;;  %v943_v48 = vsel %vm942_vm14, %v938_v54, inf }
 0x34e   : > { %v957_v27 = vsel %vm956_vm15, %v952_v28, inf  ;;  %944 = vmin.xlane.f32.xlu1 %v943_v48 }
 0x34f   : > { %958 = vmin.xlane.f32.xlu0 %v957_v27  ;;  %v2395_v0 = vpop.xlane.xlu1 %1052 }
 0x350   : > { %v2398_v10 = vpop.xlane.xlu0 %1066  ;;  %vm1054_vm0 = vcmp.eq.f32.partialorder %v2310_v1, %v2395_v0 }
 0x351   : > { %vm1068_vm1 = vcmp.eq.f32.partialorder %v2315_v4, %v2398_v10  ;;  %v1055_v57 = vsel %vm1054_vm0, %v1050_v50, inf  ;;  %v1078_v4 = vcvt.s32.f32 %v1076_v2 }
 0x352   : > { %v1069_v59 = vsel %vm1068_vm1, %v1064_v55, inf  ;;  %1056 = vmin.xlane.f32.xlu1 %v1055_v57 }
 0x353   : > { %1070 = vmin.xlane.f32.xlu0 %v1069_v59  ;;  %v2404_v63 = vpop.xlane.xlu1 %968 }
 0x354   : > { %vm970_vm3 = vcmp.eq.f32.partialorder %v2323_v11, %v2404_v63 }
 0x355   : > { %v971_v1 = vsel %vm970_vm3, %v966_v13, inf }
 0x356   : > { %972 = vmin.xlane.f32.xlu1 %v971_v1 }
 0x357   : > { %v2409_v8 = vpop.xlane.xlu1 %1080 }
 0x358   : > { %vm1082_vm4 = vcmp.eq.f32.partialorder %v2330_v12, %v2409_v8 }
 0x359   : > { %v1083_v17 = vsel %vm1082_vm4, %v1078_v4, inf }
 0x35a   : > { %1084 = vmin.xlane.f32.xlu1 %v1083_v17 }
 0x35b   : > { %1603 = shalt.err (!%p1600_p1)
}
 0x35c   : > { %s1604_s10 = scalar_lea.hbm %s2417_s0, 2048  ;;  %s1608_s16 = scalar_lea.hbm %s2527_s3, 4096 }
 0x35d   : > { %p1605_p6 = scmp.ne.s32.totalorder %s2417_s0, %s1604_s10  ;;  %p1609_p4 = scmp.lt.u32.totalorder %s2417_s0, %s2527_s3 }
 0x35e   : > { %p1610_p8 = scmp.lt.u32.totalorder %s1608_s16, %s1604_s10  ;;  %p1612_p3 = scmp.lt.u32.totalorder %s1604_s10, %s2417_s0 }
 0x35f   : > { %p1606_p2 = pnand %p1605_p6, %p2544_p12 }
 0x360   : > { %p1611_p0 = por %p1610_p8, %p1609_p4 }
 0x361   : > { %p1607_p5 = pneg %p1606_p2 }
 0x362   : > { %p1613_p13 = por %p1612_p3, %p1611_p0 }
 0x364   : > { %p1614_p7 = pnand %p1613_p13, %p1607_p5 }
 0x366   : > { %1617 = shalt.err (!%p1614_p7)
}
 0x367   : > { %s1683_s17 = smov 128   ;;  %s1684_s27 = smov 8   ;;  %v877_v11 = vcvt.f32.s32 %v2334_v26  ;;  %v989_v49 = vcvt.f32.s32 %v2339_v19  ;;  %v891_v14 = vcvt.f32.s32 %v2345_v25  ;;  %v905_v39 = vcvt.f32.s32 %v2348_v51 }
 0x368   : > { %1431 = dma.vmem_to_hbm [thread:$0]  (%p2544_p12), %s2420_s9, 2048, %s2417_s0, %s1140_s28, %s1683_s17, %s1683_s17, %s1684_s27   ;;  %v1003_v44 = vcvt.f32.s32 %v2355_v31  ;;  %v1017_v37 = vcvt.f32.s32 %v2358_v29  ;;  %v919_v36 = vcvt.f32.s32 %v2365_v38  ;;  %v933_v32 = vcvt.f32.s32 %v2368_v35 }
 0x369   : > { %v878_v12 = vshll.u32 %v877_v11, 16  ;;  %s2453_s21 = scalar_lea.vmem %s2529_s5, %s1408_s12  ;;  %v990_v15 = vshll.u32 %v989_v49, 16  ;;  %v892_v20 = vshll.u32 %v891_v14, 16  ;;  %v906_v30 = vshll.u32 %v905_v39, 16 }
 0x36a   : > { %v1004_v51 = vshll.u32 %v1003_v44, 16  ;;  %v1018_v62 = vshll.u32 %v1017_v37, 16  ;;  %v920_v41 = vshll.u32 %v919_v36, 16  ;;  %v1031_v52 = vcvt.f32.s32 %v2375_v45 }
 0x36b   : > { %v934_v42 = vshll.u32 %v933_v32, 16  ;;  %v1045_v43 = vcvt.f32.s32 %v2378_v3  ;;  %v947_v48 = vcvt.f32.s32 %v2385_v53  ;;  %v961_v58 = vcvt.f32.s32 %v2388_v60 }
 0x36c   : > { %v1032_v47 = vshll.u32 %v1031_v52, 16  ;;  %v1059_v2 = vcvt.f32.s32 %v2395_v0  ;;  %v1073_v17 = vcvt.f32.s32 %v2398_v10 }
 0x36d   : > { %v1046_v50 = vshll.u32 %v1045_v43, 16  ;;  %v948_v13 = vshll.u32 %v947_v48, 16  ;;  %v962_v4 = vshll.u32 %v961_v58, 16 }
 0x36e   : > { %v1060_v49 = vshll.u32 %v1059_v2, 16 }
 0x3c3   : > { %v875_v7 = vpop.xlane.xlu0 %874 }
 0x3c4   : > { %v876_v24 = vcvt.f32.s32 %v875_v7 }
 0x3c6   : > { %v879_v5 = vadd.s32 %v878_v12, %v876_v24  ;;  %v975_v24 = vcvt.f32.s32 %v2404_v63 }
 0x3c7   : > { %v987_v9 = vpop.xlane.xlu0 %986 }
 0x3c8   : > { %1107 = vst.msk [vmem:[%s2453_s21] sm:$0xff] %vm1090_vm2, %v879_v5  ;;  %v988_v26 = vcvt.f32.s32 %v987_v9  ;;  %v1074_v9 = vshll.u32 %v1073_v17, 16  ;;  %v976_v39 = vshll.u32 %v975_v24, 16 }
 0x3ca   : > { %v991_v19 = vadd.s32 %v990_v15, %v988_v26 }
 0x3cb   : > { %v889_v34 = vpop.xlane.xlu1 %888 }
 0x3cc   : > { %1115 = vst.msk [vmem:[%s2453_s21 + $0x40] sm:$0xff] %vm1090_vm2, %v991_v19  ;;  %v903_v21 = vpop.xlane.xlu0 %902  ;;  %v890_v18 = vcvt.f32.s32 %v889_v34  ;;  %v1087_v19 = vcvt.f32.s32 %v2409_v8 }
 0x3cd   : > { %v904_v25 = vcvt.f32.s32 %v903_v21 }
 0x3ce   : > { %v893_v6 = vadd.s32 %v892_v20, %v890_v18  ;;  %v1088_v44 = vshll.u32 %v1087_v19, 16 }
 0x3cf   : > { %v907_v56 = vadd.s32 %v906_v30, %v904_v25  ;;  %v1001_v61 = vpop.xlane.xlu1 %1000 }
 0x3d0   : > { %1108 = vst.msk [vmem:[%s2453_s21 + $0x8] sm:$0xff] %vm1090_vm2, %v893_v6  ;;  %v1015_v33 = vpop.xlane.xlu0 %1014  ;;  %v1002_v31 = vcvt.f32.s32 %v1001_v61 }
 0x3d1   : > { %1109 = vst.msk [vmem:[%s2453_s21 + $0x10] sm:$0xff] %vm1090_vm2, %v907_v56  ;;  %v1016_v16 = vcvt.f32.s32 %v1015_v33 }
 0x3d2   : > { %v1005_v29 = vadd.s32 %v1004_v51, %v1002_v31 }
 0x3d3   : > { %v1019_v22 = vadd.s32 %v1018_v62, %v1016_v16  ;;  %v917_v46 = vpop.xlane.xlu1 %916 }
 0x3d4   : > { %1116 = vst.msk [vmem:[%s2453_s21 + $0x48] sm:$0xff] %vm1090_vm2, %v1005_v29  ;;  %v931_v38 = vpop.xlane.xlu0 %930  ;;  %v918_v40 = vcvt.f32.s32 %v917_v46 }
 0x3d5   : > { %1117 = vst.msk [vmem:[%s2453_s21 + $0x50] sm:$0xff] %vm1090_vm2, %v1019_v22  ;;  %v932_v35 = vcvt.f32.s32 %v931_v38 }
 0x3d6   : > { %v921_v54 = vadd.s32 %v920_v41, %v918_v40 }
 0x3d7   : > { %v935_v23 = vadd.s32 %v934_v42, %v932_v35  ;;  %v1029_v28 = vpop.xlane.xlu1 %1028 }
 0x3d8   : > { %1110 = vst.msk [vmem:[%s2453_s21 + $0x18] sm:$0xff] %vm1090_vm2, %v921_v54  ;;  %v1043_v45 = vpop.xlane.xlu0 %1042  ;;  %v1030_v27 = vcvt.f32.s32 %v1029_v28 }
 0x3d9   : > { %1111 = vst.msk [vmem:[%s2453_s21 + $0x20] sm:$0xff] %vm1090_vm2, %v935_v23  ;;  %v1044_v3 = vcvt.f32.s32 %v1043_v45 }
 0x3da   : > { %v1033_v55 = vadd.s32 %v1032_v47, %v1030_v27 }
 0x3db   : > { %v1047_v57 = vadd.s32 %v1046_v50, %v1044_v3  ;;  %v945_v59 = vpop.xlane.xlu1 %944 }
 0x3dc   : > { %1118 = vst.msk [vmem:[%s2453_s21 + $0x58] sm:$0xff] %vm1090_vm2, %v1033_v55  ;;  %v959_v53 = vpop.xlane.xlu0 %958  ;;  %v946_v1 = vcvt.f32.s32 %v945_v59 }
 0x3dd   : > { %1119 = vst.msk [vmem:[%s2453_s21 + $0x60] sm:$0xff] %vm1090_vm2, %v1047_v57  ;;  %v960_v60 = vcvt.f32.s32 %v959_v53 }
 0x3de   : > { %v949_v11 = vadd.s32 %v948_v13, %v946_v1 }
 0x3df   : > { %v963_v7 = vadd.s32 %v962_v4, %v960_v60  ;;  %v1057_v12 = vpop.xlane.xlu1 %1056 }
 0x3e0   : > { %1112 = vst.msk [vmem:[%s2453_s21 + $0x28] sm:$0xff] %vm1090_vm2, %v949_v11  ;;  %v1071_v0 = vpop.xlane.xlu0 %1070  ;;  %v1058_v5 = vcvt.f32.s32 %v1057_v12 }
 0x3e1   : > { %1113 = vst.msk [vmem:[%s2453_s21 + $0x30] sm:$0xff] %vm1090_vm2, %v963_v7  ;;  %v1072_v10 = vcvt.f32.s32 %v1071_v0 }
 0x3e2   : > { %v1061_v15 = vadd.s32 %v1060_v49, %v1058_v5 }
 0x3e3   : > { %v1075_v14 = vadd.s32 %v1074_v9, %v1072_v10  ;;  %v973_v26 = vpop.xlane.xlu1 %972 }
 0x3e4   : > { %1120 = vst.msk [vmem:[%s2453_s21 + $0x68] sm:$0xff] %vm1090_vm2, %v1061_v15  ;;  %v974_v34 = vcvt.f32.s32 %v973_v26 }
 0x3e5   : > { %1121 = vst.msk [vmem:[%s2453_s21 + $0x70] sm:$0xff] %vm1090_vm2, %v1075_v14 }
 0x3e6   : > { %v977_v63 = vadd.s32 %v976_v39, %v974_v34 }
 0x3e7   : > { %v1085_v20 = vpop.xlane.xlu1 %1084 }
 0x3e8   : > { %1114 = vst.msk [vmem:[%s2453_s21 + $0x38] sm:$0xff] %vm1090_vm2, %v977_v63  ;;  %v1086_v21 = vcvt.f32.s32 %v1085_v20 }
 0x3ea   : > { %v1089_v18 = vadd.s32 %v1088_v44, %v1086_v21 }
 0x3ec   : > { %1122 = vst.msk [vmem:[%s2453_s21 + $0x78] sm:$0xff] %vm1090_vm2, %v1089_v18 }
 0x3ed PF: > { %s1196_s6 = sand.u32 1, %s1656_s18   ;;  %p2545_p12 = scmp.ne.s32.totalorder %s2537_s8, 0 }
 0x3ee   : > { %p2546_p10 = scmp.ge.s32.totalorder %s1676_s23, 2  ;;  %s1197_s24 = scalar_lea.sflag [#allocation5], %s1196_s6 }
 0x3f0   : > { %p1441_p9 = pnand %p2546_p10, %p2545_p12 }
 0x3f2   : > { %1651 = dma.done.wait (!%p1441_p9), %s1197_s24, 2048  }
 0x3f3   : > { %1653 = vsyncadd (!%p1441_p9), %s1197_s24, 4294965248  ;;  %s25_s23 = sadd.s32 1, %s1676_s23   ;;  %s2547_s18 = smov %s1660_s19 }
 0x3f4   : > { %p22_p11 = scmp.ge.s32.totalorder %s25_s23, 4   ;;  %s2548_s19 = smov %s1664_s20 }
 0x3f5   : > { %s2549_s20 = smov %s1771_s7  ;;  %s2550_s21 = smov %s1672_s22 }
 0x3f6   : > { %s2551_s22 = smov %s2553_s26  ;;  %24 = sbr.rel (!%p22_p11) target bundleno = 10 (0xa), region = 125 }
 0x3fd   :  { %1226 = vsyncpa [#allocation4], 1 }
 0x3fe   :  { %1228 = vsyncpa [#allocation4 + $0x1], 1 }
 0x3ff   :  { %1229 = vsyncpa [#allocation7], 1 }
 0x400   :  { %1231 = vsyncpa [#allocation7 + $0x1], 1 }
 0x401   :  { %1232 = vsyncpa [#allocation5], 1 }
 0x402   :  { %1234 = vsyncpa [#allocation5 + $0x1], 1 }

</bundles_post_ra>
